<compile_context>
chip_gen: v7x
topology: tpu7x:2x2x1
jax: 0.10.0
libtpu: 0.0.40
codegen_flags: <defaults>
</compile_context>

<pallas_src>
import jax
import jax.numpy as jnp
import numpy as np
from jax.experimental import pallas as pl
from jax.experimental.pallas import tpu as pltpu


_HIDDEN = 256  # 250 padded to an MXU/lane-aligned 256


def _round_up(x, m):
    return ((x + m - 1) // m) * m


def _pad2(a, rows, cols):
    r, c = a.shape
    return jnp.pad(a, ((0, rows - r), (0, cols - c)))


def _actor_kernel(obs_ref, mask_ref,
                  w1, b1, w2, b2, w3, b3,
                  w47, b47, w5, b5, w6, b6, w8, b8, w9, b9,
                  out1_ref, out2_ref):
    H = _HIDDEN

    def linear(x_bf16, w_ref, b_ref):
        # bf16 x bf16 MXU matmul with f32 accumulation; f32 bias add.
        return jnp.dot(x_bf16, w_ref[...],
                       preferred_element_type=jnp.float32) + b_ref[...]

    def tanh_bf16(y):
        return jnp.tanh(y).astype(jnp.bfloat16)

    x = obs_ref[...]                           # already bf16, native feature width

    # trunk producing `sen`
    a1 = tanh_bf16(linear(x, w1, b1))
    a2 = tanh_bf16(linear(a1, w2, b2))
    sen = tanh_bf16(linear(a2, w3, b3))

    # fused [layer4 | layer7]: shared input -> one (sen_pad, 2H) matmul, no waste.
    h = tanh_bf16(linear(sen, w47, b47))       # (TB, 2H) = [act3 | act6]
    h1 = h[:, :H]                              # lane-aligned static slices
    h2 = h[:, H:]

    # head 1: layer5 -> layer6 -> mask(tanh(.))
    a4 = tanh_bf16(linear(h1, w5, b5))
    z1 = linear(a4, w6, b6)                    # f32 logits, (TB, out1_pad)
    out1_ref[...] = jnp.where(mask_ref[...] != 0, jnp.tanh(z1),
                              jnp.float32(-100000000.0))

    # head 2: layer8 -> layer9 -> sigmoid
    a7 = tanh_bf16(linear(h2, w8, b8))
    z2 = linear(a7, w9, b9)                    # f32, (TB, out2_pad)
    out2_ref[...] = jax.nn.sigmoid(z2)


def init_params(key, in_dim_sen, out_dim_sen, out_ac1_dim, out_ac2_dim):
    """nn.Linear-style init U(-1/sqrt(fan_in), 1/sqrt(fan_in)).
    Weights returned as (in, out) f32; biases as (1, out) f32 (reference layout)."""
    dims = [
        (in_dim_sen, 250), (250, 250), (250, out_dim_sen),
        (out_dim_sen, 250), (250, 250), (250, out_ac1_dim),
        (out_dim_sen, 250), (250, 250), (250, out_ac2_dim),
    ]
    params = []
    for (fan_in, fan_out) in dims:
        key, kw, kb = jax.random.split(key, 3)
        bound = 1.0 / np.sqrt(fan_in)
        w = jax.random.uniform(kw, (fan_in, fan_out), jnp.float32, -bound, bound)
        b = jax.random.uniform(kb, (1, fan_out), jnp.float32, -bound, bound)
        params.append((w, b))
    return params


def prepare_params(params):
    """Pad / fuse / cast the 9 (W, b) pairs into the kernel layout:
    bf16 weights, f32 biases. Zero-filled padding keeps the math identical."""
    (w1, b1), (w2, b2), (w3, b3), (w4, b4), (w5, b5), (w6, b6), \
        (w7, b7), (w8, b8), (w9, b9) = params

    H = _HIDDEN
    in_dim = w1.shape[0]                        # kept native (no lane padding)
    sen_pad = _round_up(w3.shape[1], 128)
    out1_dim = w6.shape[1]
    out2_dim = w9.shape[1]
    out1_pad = _round_up(out1_dim, 128)
    out2_pad = _round_up(out2_dim, 128)

    W1 = _pad2(w1, in_dim, H);   B1 = _pad2(b1, 1, H)
    W2 = _pad2(w2, H, H);        B2 = _pad2(b2, 1, H)
    W3 = _pad2(w3, H, sen_pad);  B3 = _pad2(b3, 1, sen_pad)

    # layer4 | layer7 share the same input (sen): lane-concat into one matmul.
    W47 = jnp.concatenate([_pad2(w4, sen_pad, H), _pad2(w7, sen_pad, H)], axis=1)
    B47 = jnp.concatenate([_pad2(b4, 1, H), _pad2(b7, 1, H)], axis=1)

    # layers 5/8 and 6/9 as separate half-width matmuls (no block-diag zeros).
    W5 = _pad2(w5, H, H);        B5 = _pad2(b5, 1, H)
    W6 = _pad2(w6, H, out1_pad); B6 = _pad2(b6, 1, out1_pad)
    W8 = _pad2(w8, H, H);        B8 = _pad2(b8, 1, H)
    W9 = _pad2(w9, H, out2_pad); B9 = _pad2(b9, 1, out2_pad)

    flat = []
    for w, b in zip([W1, W2, W3, W47, W5, W6, W8, W9],
                    [B1, B2, B3, B47, B5, B6, B8, B9]):
        flat.append(w.astype(jnp.bfloat16))     # bf16 MXU operands
        flat.append(b.astype(jnp.float32))      # f32 biases
    dims = dict(in_dim=in_dim, out1_pad=out1_pad, out2_pad=out2_pad,
                out1_dim=out1_dim, out2_dim=out2_dim)
    return flat, dims


def feed_forward_nn_actor(obs, mask_vec, kernel_params, dims):
    """obs: (B, in_dim_sen) f32, mask_vec: (B, out_ac1_dim) bool/int.
    kernel_params/dims come from prepare_params(). Returns (out1, out2)."""
    B = obs.shape[0]
    in_dim = dims["in_dim"]
    out1_pad = dims["out1_pad"]
    out2_pad = dims["out2_pad"]
    out1_dim = dims["out1_dim"]
    out2_dim = dims["out2_dim"]

    # Batch tile: big enough to amortize the ~0.35 us per-grid-step overhead,
    # small enough to stay well inside v5e's 16 MiB scoped-VMEM default, and
    # (for medium B) giving >= 2 grid steps so v7x's second TensorCore is used.
    if B <= 64:
        TB = _round_up(B, 32)
    else:
        TB = min(512, _round_up((B + 1) // 2, 128))
    B_pad = _round_up(B, TB)

    # Slim HBM operands: obs at native feature width in bf16, mask as int8 over
    # only the head-1 lanes; batch-only padding via jnp.pad (no full-slab scatter).
    obs_p = jnp.pad(obs.astype(jnp.bfloat16), ((0, B_pad - B), (0, 0)))
    mask_p = jnp.pad(mask_vec.astype(jnp.int8),
                     ((0, B_pad - B), (0, out1_pad - out1_dim)))

    def batch_spec(cols):
        return pl.BlockSpec((TB, cols), lambda i: (i, 0))

    def resident_spec(shape):
        # Constant block index -> weight/bias stays VMEM-resident across steps.
        return pl.BlockSpec(shape, lambda i: (0, 0))

    in_specs = [batch_spec(in_dim), batch_spec(out1_pad)]
    in_specs += [resident_spec(p.shape) for p in kernel_params]

    out1, out2 = pl.pallas_call(
        _actor_kernel,
        grid=(B_pad // TB,),
        out_shape=(jax.ShapeDtypeStruct((B_pad, out1_pad), jnp.float32),
                   jax.ShapeDtypeStruct((B_pad, out2_pad), jnp.float32)),
        in_specs=in_specs,
        out_specs=(batch_spec(out1_pad), batch_spec(out2_pad)),
        compiler_params=pltpu.CompilerParams(
            dimension_semantics=("parallel",)),
    )(obs_p, mask_p, *kernel_params)

    return out1[:B, :out1_dim], out2[:B, :out2_dim]


def reference_forward(obs, mask_vec, params):
    """Pure-JAX f32 reference matching the PyTorch module."""
    def lin(x, p):
        return x @ p[0] + p[1]
    a1 = jnp.tanh(lin(obs, params[0]))
    a2 = jnp.tanh(lin(a1, params[1]))
    sen = jnp.tanh(lin(a2, params[2]))
    a3 = jnp.tanh(lin(sen, params[3]))
    a4 = jnp.tanh(lin(a3, params[4]))
    a5 = jnp.tanh(lin(a4, params[5]))
    out1 = jnp.where(mask_vec, a5, -100000000.0)
    a6 = jnp.tanh(lin(sen, params[6]))
    a7 = jnp.tanh(lin(a6, params[7]))
    out2 = jax.nn.sigmoid(lin(a7, params[8]))
    return out1, out2


if __name__ == "__main__":
    # Small shapes consistent with the module's constructor.
    B = 8
    in_dim_sen = 32
    out_dim_sen = 16
    out_ac1_dim = 10
    out_ac2_dim = 6

    key = jax.random.PRNGKey(0)
    key, k_obs, k_mask = jax.random.split(key, 3)

    obs = jax.random.normal(k_obs, (B, in_dim_sen), jnp.float32)
    mask_vec = jax.random.bernoulli(k_mask, 0.7, (B, out_ac1_dim))

    params = init_params(key, in_dim_sen, out_dim_sen, out_ac1_dim, out_ac2_dim)
    kernel_params, dims = prepare_params(params)

    out1, out2 = feed_forward_nn_actor(obs, mask_vec, kernel_params, dims)
    jax.block_until_ready((out1, out2))

    assert out1.shape == (B, out_ac1_dim) and out2.shape == (B, out_ac2_dim)

    ref1, ref2 = reference_forward(obs, mask_vec, params)
    # bf16 weights/activations on the MXU (f32 accumulation) => loosened tolerance.
    np.testing.assert_allclose(np.asarray(out1), np.asarray(ref1), rtol=5e-2, atol=5e-2)
    np.testing.assert_allclose(np.asarray(out2), np.asarray(ref2), rtol=5e-2, atol=5e-2)

    print("KERNEL_OK")
</pallas_src>

<mosaic_0001>
module attributes {stable_mosaic.version = 11 : i64} {
  func.func @_actor_kernel(%arg0: i32, %arg1: memref<32x32xbf16, #tpu.memory_space<vmem>>, %arg2: memref<32x128xi8, #tpu.memory_space<vmem>>, %arg3: memref<32x256xbf16, #tpu.memory_space<vmem>>, %arg4: memref<1x256xf32, #tpu.memory_space<vmem>>, %arg5: memref<256x256xbf16, #tpu.memory_space<vmem>>, %arg6: memref<1x256xf32, #tpu.memory_space<vmem>>, %arg7: memref<256x128xbf16, #tpu.memory_space<vmem>>, %arg8: memref<1x128xf32, #tpu.memory_space<vmem>>, %arg9: memref<128x512xbf16, #tpu.memory_space<vmem>>, %arg10: memref<1x512xf32, #tpu.memory_space<vmem>>, %arg11: memref<256x256xbf16, #tpu.memory_space<vmem>>, %arg12: memref<1x256xf32, #tpu.memory_space<vmem>>, %arg13: memref<256x128xbf16, #tpu.memory_space<vmem>>, %arg14: memref<1x128xf32, #tpu.memory_space<vmem>>, %arg15: memref<256x256xbf16, #tpu.memory_space<vmem>>, %arg16: memref<1x256xf32, #tpu.memory_space<vmem>>, %arg17: memref<256x128xbf16, #tpu.memory_space<vmem>>, %arg18: memref<1x128xf32, #tpu.memory_space<vmem>>, %arg19: memref<32x128xf32, #tpu.memory_space<vmem>>, %arg20: memref<32x128xf32, #tpu.memory_space<vmem>>) attributes {dimension_semantics = [#tpu.dimension_semantics<parallel>], iteration_bounds = array<i64: 1>, scalar_prefetch = 0 : i64, scratch_operands = 0 : i64, tpu.core_type = #tpu.core_type<tc>, window_params = [{transform_indices = @transform_0, window_bounds = array<i64: 32, 32>}, {transform_indices = @transform_1, window_bounds = array<i64: 32, 128>}, {pipeline_mode = #tpu.pipeline_mode<synchronous>, transform_indices = @transform_2, window_bounds = array<i64: 32, 256>}, {pipeline_mode = #tpu.pipeline_mode<synchronous>, transform_indices = @transform_3, window_bounds = array<i64: 1, 256>}, {pipeline_mode = #tpu.pipeline_mode<synchronous>, transform_indices = @transform_4, window_bounds = array<i64: 256, 256>}, {pipeline_mode = #tpu.pipeline_mode<synchronous>, transform_indices = @transform_5, window_bounds = array<i64: 1, 256>}, {pipeline_mode = #tpu.pipeline_mode<synchronous>, transform_indices = @transform_6, window_bounds = array<i64: 256, 128>}, {pipeline_mode = #tpu.pipeline_mode<synchronous>, transform_indices = @transform_7, window_bounds = array<i64: 1, 128>}, {pipeline_mode = #tpu.pipeline_mode<synchronous>, transform_indices = @transform_8, window_bounds = array<i64: 128, 512>}, {pipeline_mode = #tpu.pipeline_mode<synchronous>, transform_indices = @transform_9, window_bounds = array<i64: 1, 512>}, {pipeline_mode = #tpu.pipeline_mode<synchronous>, transform_indices = @transform_10, window_bounds = array<i64: 256, 256>}, {pipeline_mode = #tpu.pipeline_mode<synchronous>, transform_indices = @transform_11, window_bounds = array<i64: 1, 256>}, {pipeline_mode = #tpu.pipeline_mode<synchronous>, transform_indices = @transform_12, window_bounds = array<i64: 256, 128>}, {pipeline_mode = #tpu.pipeline_mode<synchronous>, transform_indices = @transform_13, window_bounds = array<i64: 1, 128>}, {pipeline_mode = #tpu.pipeline_mode<synchronous>, transform_indices = @transform_14, window_bounds = array<i64: 256, 256>}, {pipeline_mode = #tpu.pipeline_mode<synchronous>, transform_indices = @transform_15, window_bounds = array<i64: 1, 256>}, {pipeline_mode = #tpu.pipeline_mode<synchronous>, transform_indices = @transform_16, window_bounds = array<i64: 256, 128>}, {pipeline_mode = #tpu.pipeline_mode<synchronous>, transform_indices = @transform_17, window_bounds = array<i64: 1, 128>}, {transform_indices = @transform_18, window_bounds = array<i64: 32, 128>}, {transform_indices = @transform_19, window_bounds = array<i64: 32, 128>}]} {
    %c0 = arith.constant 0 : index
    %c0_0 = arith.constant 0 : index
    %0 = vector.load %arg1[%c0, %c0_0] : memref<32x32xbf16, #tpu.memory_space<vmem>>, vector<32x32xbf16>
    %c0_1 = arith.constant 0 : index
    %c0_2 = arith.constant 0 : index
    %1 = vector.load %arg3[%c0_1, %c0_2] : memref<32x256xbf16, #tpu.memory_space<vmem>>, vector<32x256xbf16>
    %cst = arith.constant dense<0.000000e+00> : vector<32x256xf32>
    %2 = tpu.matmul %0, %1, %cst {dimension_numbers = #tpu.dot_dimension_numbers<[1], [0], [0], [1], [0, 0, 1, 1], [], []>} : vector<32x32xbf16>, vector<32x256xbf16>, vector<32x256xf32> -> vector<32x256xf32>
    %c0_3 = arith.constant 0 : index
    %c0_4 = arith.constant 0 : index
    %3 = vector.load %arg4[%c0_3, %c0_4] : memref<1x256xf32, #tpu.memory_space<vmem>>, vector<1x256xf32>
    %4 = vector.broadcast %3 : vector<1x256xf32> to vector<32x256xf32>
    %5 = arith.addf %2, %4 : vector<32x256xf32>
    %6 = math.tanh %5 : vector<32x256xf32>
    %7 = arith.truncf %6 : vector<32x256xf32> to vector<32x256xbf16>
    %c0_5 = arith.constant 0 : index
    %c0_6 = arith.constant 0 : index
    %8 = vector.load %arg5[%c0_5, %c0_6] : memref<256x256xbf16, #tpu.memory_space<vmem>>, vector<256x256xbf16>
    %cst_7 = arith.constant dense<0.000000e+00> : vector<32x256xf32>
    %9 = tpu.matmul %7, %8, %cst_7 {dimension_numbers = #tpu.dot_dimension_numbers<[1], [0], [0], [1], [0, 0, 1, 1], [], []>} : vector<32x256xbf16>, vector<256x256xbf16>, vector<32x256xf32> -> vector<32x256xf32>
    %c0_8 = arith.constant 0 : index
    %c0_9 = arith.constant 0 : index
    %10 = vector.load %arg6[%c0_8, %c0_9] : memref<1x256xf32, #tpu.memory_space<vmem>>, vector<1x256xf32>
    %11 = vector.broadcast %10 : vector<1x256xf32> to vector<32x256xf32>
    %12 = arith.addf %9, %11 : vector<32x256xf32>
    %13 = math.tanh %12 : vector<32x256xf32>
    %14 = arith.truncf %13 : vector<32x256xf32> to vector<32x256xbf16>
    %c0_10 = arith.constant 0 : index
    %c0_11 = arith.constant 0 : index
    %15 = vector.load %arg7[%c0_10, %c0_11] : memref<256x128xbf16, #tpu.memory_space<vmem>>, vector<256x128xbf16>
    %cst_12 = arith.constant dense<0.000000e+00> : vector<32x128xf32>
    %16 = tpu.matmul %14, %15, %cst_12 {dimension_numbers = #tpu.dot_dimension_numbers<[1], [0], [0], [1], [0, 0, 1, 1], [], []>} : vector<32x256xbf16>, vector<256x128xbf16>, vector<32x128xf32> -> vector<32x128xf32>
    %c0_13 = arith.constant 0 : index
    %c0_14 = arith.constant 0 : index
    %17 = vector.load %arg8[%c0_13, %c0_14] : memref<1x128xf32, #tpu.memory_space<vmem>>, vector<1x128xf32>
    %18 = vector.broadcast %17 : vector<1x128xf32> to vector<32x128xf32>
    %19 = arith.addf %16, %18 : vector<32x128xf32>
    %20 = math.tanh %19 : vector<32x128xf32>
    %21 = arith.truncf %20 : vector<32x128xf32> to vector<32x128xbf16>
    %c0_15 = arith.constant 0 : index
    %c0_16 = arith.constant 0 : index
    %22 = vector.load %arg9[%c0_15, %c0_16] : memref<128x512xbf16, #tpu.memory_space<vmem>>, vector<128x512xbf16>
    %cst_17 = arith.constant dense<0.000000e+00> : vector<32x512xf32>
    %23 = tpu.matmul %21, %22, %cst_17 {dimension_numbers = #tpu.dot_dimension_numbers<[1], [0], [0], [1], [0, 0, 1, 1], [], []>} : vector<32x128xbf16>, vector<128x512xbf16>, vector<32x512xf32> -> vector<32x512xf32>
    %c0_18 = arith.constant 0 : index
    %c0_19 = arith.constant 0 : index
    %24 = vector.load %arg10[%c0_18, %c0_19] : memref<1x512xf32, #tpu.memory_space<vmem>>, vector<1x512xf32>
    %25 = vector.broadcast %24 : vector<1x512xf32> to vector<32x512xf32>
    %26 = arith.addf %23, %25 : vector<32x512xf32>
    %27 = math.tanh %26 : vector<32x512xf32>
    %28 = arith.truncf %27 : vector<32x512xf32> to vector<32x512xbf16>
    %29 = vector.extract_strided_slice %28 {offsets = [0, 0], sizes = [32, 256], strides = [1, 1]} : vector<32x512xbf16> to vector<32x256xbf16>
    %30 = vector.extract_strided_slice %28 {offsets = [0, 256], sizes = [32, 256], strides = [1, 1]} : vector<32x512xbf16> to vector<32x256xbf16>
    %c0_20 = arith.constant 0 : index
    %c0_21 = arith.constant 0 : index
    %31 = vector.load %arg11[%c0_20, %c0_21] : memref<256x256xbf16, #tpu.memory_space<vmem>>, vector<256x256xbf16>
    %cst_22 = arith.constant dense<0.000000e+00> : vector<32x256xf32>
    %32 = tpu.matmul %29, %31, %cst_22 {dimension_numbers = #tpu.dot_dimension_numbers<[1], [0], [0], [1], [0, 0, 1, 1], [], []>} : vector<32x256xbf16>, vector<256x256xbf16>, vector<32x256xf32> -> vector<32x256xf32>
    %c0_23 = arith.constant 0 : index
    %c0_24 = arith.constant 0 : index
    %33 = vector.load %arg12[%c0_23, %c0_24] : memref<1x256xf32, #tpu.memory_space<vmem>>, vector<1x256xf32>
    %34 = vector.broadcast %33 : vector<1x256xf32> to vector<32x256xf32>
    %35 = arith.addf %32, %34 : vector<32x256xf32>
    %36 = math.tanh %35 : vector<32x256xf32>
    %37 = arith.truncf %36 : vector<32x256xf32> to vector<32x256xbf16>
    %c0_25 = arith.constant 0 : index
    %c0_26 = arith.constant 0 : index
    %38 = vector.load %arg13[%c0_25, %c0_26] : memref<256x128xbf16, #tpu.memory_space<vmem>>, vector<256x128xbf16>
    %cst_27 = arith.constant dense<0.000000e+00> : vector<32x128xf32>
    %39 = tpu.matmul %37, %38, %cst_27 {dimension_numbers = #tpu.dot_dimension_numbers<[1], [0], [0], [1], [0, 0, 1, 1], [], []>} : vector<32x256xbf16>, vector<256x128xbf16>, vector<32x128xf32> -> vector<32x128xf32>
    %c0_28 = arith.constant 0 : index
    %c0_29 = arith.constant 0 : index
    %40 = vector.load %arg14[%c0_28, %c0_29] : memref<1x128xf32, #tpu.memory_space<vmem>>, vector<1x128xf32>
    %41 = vector.broadcast %40 : vector<1x128xf32> to vector<32x128xf32>
    %42 = arith.addf %39, %41 : vector<32x128xf32>
    %c0_30 = arith.constant 0 : index
    %c0_31 = arith.constant 0 : index
    %43 = vector.load %arg2[%c0_30, %c0_31] : memref<32x128xi8, #tpu.memory_space<vmem>>, vector<32x128xi8>
    %c0_i8 = arith.constant 0 : i8
    %44 = vector.broadcast %c0_i8 : i8 to vector<32x128xi8>
    %45 = arith.cmpi ne, %43, %44 : vector<32x128xi8>
    %46 = math.tanh %42 : vector<32x128xf32>
    %cst_32 = arith.constant -1.000000e+08 : f32
    %47 = vector.broadcast %cst_32 : f32 to vector<32x128xf32>
    %48 = arith.select %45, %46, %47 : vector<32x128xi1>, vector<32x128xf32>
    %c0_33 = arith.constant 0 : index
    %c0_34 = arith.constant 0 : index
    %49 = vector.load %arg19[%c0_33, %c0_34] : memref<32x128xf32, #tpu.memory_space<vmem>>, vector<32x128xf32>
    tpu.vector_store %arg19[%c0_33, %c0_34], %48 {strides = array<i32>} : memref<32x128xf32, #tpu.memory_space<vmem>>, vector<32x128xf32>,
    %c0_35 = arith.constant 0 : index
    %c0_36 = arith.constant 0 : index
    %50 = vector.load %arg15[%c0_35, %c0_36] : memref<256x256xbf16, #tpu.memory_space<vmem>>, vector<256x256xbf16>
    %cst_37 = arith.constant dense<0.000000e+00> : vector<32x256xf32>
    %51 = tpu.matmul %30, %50, %cst_37 {dimension_numbers = #tpu.dot_dimension_numbers<[1], [0], [0], [1], [0, 0, 1, 1], [], []>} : vector<32x256xbf16>, vector<256x256xbf16>, vector<32x256xf32> -> vector<32x256xf32>
    %c0_38 = arith.constant 0 : index
    %c0_39 = arith.constant 0 : index
    %52 = vector.load %arg16[%c0_38, %c0_39] : memref<1x256xf32, #tpu.memory_space<vmem>>, vector<1x256xf32>
    %53 = vector.broadcast %52 : vector<1x256xf32> to vector<32x256xf32>
    %54 = arith.addf %51, %53 : vector<32x256xf32>
    %55 = math.tanh %54 : vector<32x256xf32>
    %56 = arith.truncf %55 : vector<32x256xf32> to vector<32x256xbf16>
    %c0_40 = arith.constant 0 : index
    %c0_41 = arith.constant 0 : index
    %57 = vector.load %arg17[%c0_40, %c0_41] : memref<256x128xbf16, #tpu.memory_space<vmem>>, vector<256x128xbf16>
    %cst_42 = arith.constant dense<0.000000e+00> : vector<32x128xf32>
    %58 = tpu.matmul %56, %57, %cst_42 {dimension_numbers = #tpu.dot_dimension_numbers<[1], [0], [0], [1], [0, 0, 1, 1], [], []>} : vector<32x256xbf16>, vector<256x128xbf16>, vector<32x128xf32> -> vector<32x128xf32>
    %c0_43 = arith.constant 0 : index
    %c0_44 = arith.constant 0 : index
    %59 = vector.load %arg18[%c0_43, %c0_44] : memref<1x128xf32, #tpu.memory_space<vmem>>, vector<1x128xf32>
    %60 = vector.broadcast %59 : vector<1x128xf32> to vector<32x128xf32>
    %61 = arith.addf %58, %60 : vector<32x128xf32>
    %62 = arith.negf %61 : vector<32x128xf32>
    %63 = math.exp %62 : vector<32x128xf32>
    %cst_45 = arith.constant 1.000000e+00 : f32
    %64 = vector.broadcast %cst_45 : f32 to vector<32x128xf32>
    %65 = arith.addf %64, %63 : vector<32x128xf32>
    %66 = arith.divf %64, %65 : vector<32x128xf32>
    %c0_46 = arith.constant 0 : index
    %c0_47 = arith.constant 0 : index
    %67 = vector.load %arg20[%c0_46, %c0_47] : memref<32x128xf32, #tpu.memory_space<vmem>>, vector<32x128xf32>
    tpu.vector_store %arg20[%c0_46, %c0_47], %66 {strides = array<i32>} : memref<32x128xf32, #tpu.memory_space<vmem>>, vector<32x128xf32>,
    return
  }
  func.func @transform_0(%arg0: i32) -> (i32, i32) {
    %c0_i32 = arith.constant 0 : i32
    %c0_i32_0 = arith.constant 0 : i32
    return %arg0, %c0_i32 : i32, i32
  }
  func.func @transform_1(%arg0: i32) -> (i32, i32) {
    %c0_i32 = arith.constant 0 : i32
    %c0_i32_0 = arith.constant 0 : i32
    return %arg0, %c0_i32 : i32, i32
  }
  func.func @transform_2(%arg0: i32) -> (i32, i32) {
    %c0_i32 = arith.constant 0 : i32
    %c0_i32_0 = arith.constant 0 : i32
    %c0_i32_1 = arith.constant 0 : i32
    return %c0_i32, %c0_i32_0 : i32, i32
  }
  func.func @transform_3(%arg0: i32) -> (i32, i32) {
    %c0_i32 = arith.constant 0 : i32
    %c0_i32_0 = arith.constant 0 : i32
    %c0_i32_1 = arith.constant 0 : i32
    return %c0_i32, %c0_i32_0 : i32, i32
  }
  func.func @transform_4(%arg0: i32) -> (i32, i32) {
    %c0_i32 = arith.constant 0 : i32
    %c0_i32_0 = arith.constant 0 : i32
    %c0_i32_1 = arith.constant 0 : i32
    return %c0_i32, %c0_i32_0 : i32, i32
  }
  func.func @transform_5(%arg0: i32) -> (i32, i32) {
    %c0_i32 = arith.constant 0 : i32
    %c0_i32_0 = arith.constant 0 : i32
    %c0_i32_1 = arith.constant 0 : i32
    return %c0_i32, %c0_i32_0 : i32, i32
  }
  func.func @transform_6(%arg0: i32) -> (i32, i32) {
    %c0_i32 = arith.constant 0 : i32
    %c0_i32_0 = arith.constant 0 : i32
    %c0_i32_1 = arith.constant 0 : i32
    return %c0_i32, %c0_i32_0 : i32, i32
  }
  func.func @transform_7(%arg0: i32) -> (i32, i32) {
    %c0_i32 = arith.constant 0 : i32
    %c0_i32_0 = arith.constant 0 : i32
    %c0_i32_1 = arith.constant 0 : i32
    return %c0_i32, %c0_i32_0 : i32, i32
  }
  func.func @transform_8(%arg0: i32) -> (i32, i32) {
    %c0_i32 = arith.constant 0 : i32
    %c0_i32_0 = arith.constant 0 : i32
    %c0_i32_1 = arith.constant 0 : i32
    return %c0_i32, %c0_i32_0 : i32, i32
  }
  func.func @transform_9(%arg0: i32) -> (i32, i32) {
    %c0_i32 = arith.constant 0 : i32
    %c0_i32_0 = arith.constant 0 : i32
    %c0_i32_1 = arith.constant 0 : i32
    return %c0_i32, %c0_i32_0 : i32, i32
  }
  func.func @transform_10(%arg0: i32) -> (i32, i32) {
    %c0_i32 = arith.constant 0 : i32
    %c0_i32_0 = arith.constant 0 : i32
    %c0_i32_1 = arith.constant 0 : i32
    return %c0_i32, %c0_i32_0 : i32, i32
  }
  func.func @transform_11(%arg0: i32) -> (i32, i32) {
    %c0_i32 = arith.constant 0 : i32
    %c0_i32_0 = arith.constant 0 : i32
    %c0_i32_1 = arith.constant 0 : i32
    return %c0_i32, %c0_i32_0 : i32, i32
  }
  func.func @transform_12(%arg0: i32) -> (i32, i32) {
    %c0_i32 = arith.constant 0 : i32
    %c0_i32_0 = arith.constant 0 : i32
    %c0_i32_1 = arith.constant 0 : i32
    return %c0_i32, %c0_i32_0 : i32, i32
  }
  func.func @transform_13(%arg0: i32) -> (i32, i32) {
    %c0_i32 = arith.constant 0 : i32
    %c0_i32_0 = arith.constant 0 : i32
    %c0_i32_1 = arith.constant 0 : i32
    return %c0_i32, %c0_i32_0 : i32, i32
  }
  func.func @transform_14(%arg0: i32) -> (i32, i32) {
    %c0_i32 = arith.constant 0 : i32
    %c0_i32_0 = arith.constant 0 : i32
    %c0_i32_1 = arith.constant 0 : i32
    return %c0_i32, %c0_i32_0 : i32, i32
  }
  func.func @transform_15(%arg0: i32) -> (i32, i32) {
    %c0_i32 = arith.constant 0 : i32
    %c0_i32_0 = arith.constant 0 : i32
    %c0_i32_1 = arith.constant 0 : i32
    return %c0_i32, %c0_i32_0 : i32, i32
  }
  func.func @transform_16(%arg0: i32) -> (i32, i32) {
    %c0_i32 = arith.constant 0 : i32
    %c0_i32_0 = arith.constant 0 : i32
    %c0_i32_1 = arith.constant 0 : i32
    return %c0_i32, %c0_i32_0 : i32, i32
  }
  func.func @transform_17(%arg0: i32) -> (i32, i32) {
    %c0_i32 = arith.constant 0 : i32
    %c0_i32_0 = arith.constant 0 : i32
    %c0_i32_1 = arith.constant 0 : i32
    return %c0_i32, %c0_i32_0 : i32, i32
  }
  func.func @transform_18(%arg0: i32) -> (i32, i32) {
    %c0_i32 = arith.constant 0 : i32
    %c0_i32_0 = arith.constant 0 : i32
    return %arg0, %c0_i32 : i32, i32
  }
  func.func @transform_19(%arg0: i32) -> (i32, i32) {
    %c0_i32 = arith.constant 0 : i32
    %c0_i32_0 = arith.constant 0 : i32
    return %arg0, %c0_i32 : i32, i32
  }
}

</mosaic_0001>

<bundles_post_ra>
// kernel: tpu_custom_call.1
= control target key start
LH: loop header
LB: loop body
LE: loop exit
PB: predicated region body
PF: predicated region fallthrough
CT: control target
= control target key end

     0   :  { %s3476_s0 = inlined_call_operand.hbm [shape: bf16[32,32], index: 0, kind: input, shape index: {}]   ;;  %s3477_s1 = inlined_call_operand.hbm [shape: s8[32,128], index: 1, kind: input, shape index: {}]   ;;  %s3478_s2 = inlined_call_operand.hbm [shape: bf16[32,256], index: 2, kind: input, shape index: {}]   ;;  %s3479_s3 = inlined_call_operand.vmem [shape: f32[1,256], index: 3, kind: input, shape index: {}]   ;;  %s3480_s4 = inlined_call_operand.hbm [shape: bf16[256,256], index: 4, kind: input, shape index: {}]   ;;  %s3481_s5 = inlined_call_operand.vmem [shape: f32[1,256], index: 5, kind: input, shape index: {}]   ;;  %s3482_s6 = inlined_call_operand.hbm [shape: bf16[256,128], index: 6, kind: input, shape index: {}]   ;;  %s3483_s7 = inlined_call_operand.vmem [shape: f32[1,128], index: 7, kind: input, shape index: {}]   ;;  %s3484_s8 = inlined_call_operand.hbm [shape: bf16[128,512], index: 8, kind: input, shape index: {}]   ;;  %s3485_s9 = inlined_call_operand.vmem [shape: f32[1,512], index: 9, kind: input, shape index: {}]   ;;  %s3486_s10 = inlined_call_operand.hbm [shape: bf16[256,256], index: 10, kind: input, shape index: {}]   ;;  %s3487_s11 = inlined_call_operand.vmem [shape: f32[1,256], index: 11, kind: input, shape index: {}]   ;;  %s3488_s12 = inlined_call_operand.hbm [shape: bf16[256,128], index: 12, kind: input, shape index: {}]   ;;  %s3489_s13 = inlined_call_operand.vmem [shape: f32[1,128], index: 13, kind: input, shape index: {}]   ;;  %s3490_s14 = inlined_call_operand.hbm [shape: bf16[256,256], index: 14, kind: input, shape index: {}]   ;;  %s3491_s15 = inlined_call_operand.vmem [shape: f32[1,256], index: 15, kind: input, shape index: {}]   ;;  %s3492_s16 = inlined_call_operand.hbm [shape: bf16[256,128], index: 16, kind: input, shape index: {}]   ;;  %s3493_s17 = inlined_call_operand.vmem [shape: f32[1,128], index: 17, kind: input, shape index: {}]   ;;  %s3494_s18 = inlined_call_operand.hbm [shape: f32[32,128], index: 18, kind: output, shape index: {0}]   ;;  %s3495_s19 = inlined_call_operand.hbm [shape: f32[32,128], index: 19, kind: output, shape index: {1}]  }
   0x1   :  { %3503 = sst [smem:[#allocation30_spill]] %s3476_s0 }
   0x2   :  { %3504 = sst [smem:[#allocation31_spill]] %s3477_s1 }
   0x3   :  { %3505 = sst [smem:[#allocation32_spill]] %s3478_s2 }
   0x4   :  { %3506 = sst [smem:[#allocation33_spill]] %s3479_s3 }
   0x5   :  { %25 = vsyncpa [#allocation3], 0 }
   0x6   :  { %26 = vsyncpa [#allocation6], 0 }
   0x7   :  { %27 = vsyncpa [#allocation9], 0 }
   0x8   :  { %28 = vsyncpa [#allocation12], 0 }
   0x9   :  { %29 = vsyncpa [#allocation15], 0 }
   0xa   :  { %30 = vsyncpa [#allocation18], 0 }
   0xb   :  { %31 = vsyncpa [#allocation4], 0 }
   0xc   :  { %32 = vsyncpa [#allocation21], 0  ;;  %s3090_s0 = smov [#allocation5]   ;;  %s3507_s1 = sld [smem:[#allocation31_spill]] }
   0xd   :  { %s51_s30 = sshll.u32 %s3090_s0, 4  ;;  %s52_s30 = int_to_ptr.vmem [resolvable:$true] %s51_s30 }
  0x12   :  { %s2810_s22 = scalar_lea.hbm %s3507_s1, 128 }
  0x13   :  { %p2811_p0 = scmp.ne.s32.totalorder %s3507_s1, %s2810_s22  ;;  %p2814_p1 = scmp.lt.u32.totalorder %s2810_s22, %s3507_s1 }
  0x15   :  { %p2816_p2 = pnand %p2814_p1, %p2811_p0 }
  0x17   :  { %2819 = shalt.err (!%p2816_p2)
}
  0x18   :  { %s2820_s3 = scalar_lea.vmem %s52_s30, 128  ;;  %p2825_p4 = scmp.lt.s32.totalorder %s52_s30, %s52_s30 }
  0x19   :  { %p2821_p3 = scmp.ne.s32.totalorder %s52_s30, %s2820_s3  ;;  %p2826_p5 = scmp.lt.s32.totalorder %s2820_s3, %s2820_s3 }
  0x1b   :  { %p2827_p6 = por %p2826_p5, %p2825_p4 }
  0x1d   :  { %p2828_p7 = pnand %p2827_p6, %p2821_p3 }
  0x1f   :  { %2831 = shalt.err (!%p2828_p7)
}
  0x20   :  { %54 = dma.hbm_to_vmem [thread:$0]  %s3507_s1, 128, %s52_s30, [#allocation6]  }
  0x21   :  { %s3091_s28 = smov [#allocation8]   ;;  %s3092_s0 = smov [#allocation11]  }
  0x22   :  { %s74_s29 = sshll.u32 %s3091_s28, 4  ;;  %s102_s20 = sshll.u32 %s3092_s0, 4  ;;  %s75_s29 = int_to_ptr.vmem [resolvable:$true] %s74_s29  ;;  %s103_s20 = int_to_ptr.vmem [resolvable:$true] %s102_s20 }
  0x23   :  { %s2832_s2 = scalar_lea.hbm %s3480_s4, 4096 }
  0x24   :  { %p2833_p8 = scmp.ne.s32.totalorder %s3480_s4, %s2832_s2  ;;  %p2836_p9 = scmp.lt.u32.totalorder %s2832_s2, %s3480_s4 }
  0x26   :  { %p2838_p10 = pnand %p2836_p9, %p2833_p8 }
  0x28   :  { %2841 = shalt.err (!%p2838_p10)
}
  0x29   :  { %s2842_s30 = scalar_lea.vmem %s75_s29, 4096  ;;  %p2847_p12 = scmp.lt.s32.totalorder %s75_s29, %s75_s29 }
  0x2a   :  { %p2843_p11 = scmp.ne.s32.totalorder %s75_s29, %s2842_s30  ;;  %p2848_p13 = scmp.lt.s32.totalorder %s2842_s30, %s2842_s30 }
  0x2c   :  { %p2849_p0 = por %p2848_p13, %p2847_p12 }
  0x2e   :  { %p2850_p1 = pnand %p2849_p0, %p2843_p11 }
  0x30   :  { %2853 = shalt.err (!%p2850_p1)
}
  0x31   :  { %s3499_s1 = smov 128   ;;  %s3501_s26 = smov 8  }
  0x32   :  { %80 = dma.hbm_to_vmem [thread:$0]  %s3480_s4, 4096, %s75_s29, [#allocation9], %s3499_s1, %s3499_s1, %s3501_s26  }
  0x33   :  { %s2854_s22 = scalar_lea.hbm %s3484_s8, 4096 }
  0x34   :  { %p2855_p2 = scmp.ne.s32.totalorder %s3484_s8, %s2854_s22  ;;  %p2858_p3 = scmp.lt.u32.totalorder %s2854_s22, %s3484_s8 }
  0x36   :  { %p2860_p4 = pnand %p2858_p3, %p2855_p2 }
  0x38   :  { %2863 = shalt.err (!%p2860_p4)
}
  0x39   :  { %s2864_s3 = scalar_lea.vmem %s103_s20, 4096  ;;  %p2869_p6 = scmp.lt.s32.totalorder %s103_s20, %s103_s20 }
  0x3a   :  { %p2865_p5 = scmp.ne.s32.totalorder %s103_s20, %s2864_s3  ;;  %p2870_p7 = scmp.lt.s32.totalorder %s2864_s3, %s2864_s3 }
  0x3c   :  { %p2871_p8 = por %p2870_p7, %p2869_p6 }
  0x3e   :  { %p2872_p9 = pnand %p2871_p8, %p2865_p5 }
  0x40   :  { %2875 = shalt.err (!%p2872_p9)
}
  0x41   :  { %s3095_s4 = smov 256   ;;  %s3096_s29 = smov 16  }
  0x42   :  { %108 = dma.hbm_to_vmem [thread:$0]  %s3484_s8, 4096, %s103_s20, [#allocation12], %s3095_s4, %s3095_s4, %s3096_s29  }
  0x43   :  { %s3097_s28 = smov [#allocation14]   ;;  %s3098_s21 = smov [#allocation2]  }
  0x44   :  { %s130_s0 = sshll.u32 %s3097_s28, 4  ;;  %s38_s22 = sshll.u32 %s3098_s21, 4  ;;  %s131_s0 = int_to_ptr.vmem [resolvable:$true] %s130_s0  ;;  %s39_s22 = int_to_ptr.vmem [resolvable:$true] %s38_s22 }
  0x45   :  { %s2876_s24 = scalar_lea.hbm %s3488_s12, 2048 }
  0x46   :  { %p2877_p10 = scmp.ne.s32.totalorder %s3488_s12, %s2876_s24  ;;  %p2880_p11 = scmp.lt.u32.totalorder %s2876_s24, %s3488_s12 }
  0x48   :  { %p2882_p12 = pnand %p2880_p11, %p2877_p10 }
  0x4a   :  { %2885 = shalt.err (!%p2882_p12)
}
  0x4b   :  { %s2886_s8 = scalar_lea.vmem %s131_s0, 2048  ;;  %p2891_p0 = scmp.lt.s32.totalorder %s131_s0, %s131_s0 }
  0x4c   :  { %p2887_p13 = scmp.ne.s32.totalorder %s131_s0, %s2886_s8  ;;  %p2892_p1 = scmp.lt.s32.totalorder %s2886_s8, %s2886_s8 }
  0x4e   :  { %p2893_p2 = por %p2892_p1, %p2891_p0 }
  0x50   :  { %p2894_p3 = pnand %p2893_p2, %p2887_p13 }
  0x52   :  { %2897 = shalt.err (!%p2894_p3)
}
  0x53   :  { %s3099_s20 = smov 64   ;;  %s3100_s4 = smov 4  }
  0x54   :  { %136 = dma.hbm_to_vmem [thread:$0]  %s3488_s12, 2048, %s131_s0, [#allocation15], %s3099_s20, %s3099_s20, %s3100_s4  }
  0x55   :  { %s3508_s27 = sld [smem:[#allocation30_spill]] }
  0x5b   :  { %s2898_s28 = scalar_lea.hbm %s3508_s27, 256 }
  0x5c   :  { %p2899_p4 = scmp.ne.s32.totalorder %s3508_s27, %s2898_s28  ;;  %p2902_p5 = scmp.lt.u32.totalorder %s2898_s28, %s3508_s27 }
  0x5e   :  { %p2904_p6 = pnand %p2902_p5, %p2899_p4 }
  0x60   :  { %2907 = shalt.err (!%p2904_p6)
}
  0x61   :  { %s2908_s25 = scalar_lea.vmem %s39_s22, 256  ;;  %p2913_p8 = scmp.lt.s32.totalorder %s39_s22, %s39_s22 }
  0x62   :  { %p2909_p7 = scmp.ne.s32.totalorder %s39_s22, %s2908_s25  ;;  %p2914_p9 = scmp.lt.s32.totalorder %s2908_s25, %s2908_s25 }
  0x64   :  { %p2915_p10 = por %p2914_p9, %p2913_p8 }
  0x66   :  { %p2916_p11 = pnand %p2915_p10, %p2909_p7 }
  0x68   :  { %2919 = shalt.err (!%p2916_p11)
}
  0x69   :  { %44 = dma.hbm_to_vmem [thread:$0]  %s3508_s27, 256, %s39_s22, [#allocation3], %s3099_s20, %s3099_s20, %s3100_s4  }
  0x6a   :  { %s3101_s3 = smov [#allocation7]   ;;  %s3102_s29 = smov [#allocation10]  }
  0x6b   :  { %s60_s8 = sshll.u32 %s3101_s3, 4  ;;  %s88_s30 = sshll.u32 %s3102_s29, 4  ;;  %s61_s8 = int_to_ptr.vmem [resolvable:$true] %s60_s8  ;;  %s89_s30 = int_to_ptr.vmem [resolvable:$true] %s88_s30 }
  0x6c   :  { %s3509_s28 = sld [smem:[#allocation32_spill]] }
  0x72   :  { %s2920_s21 = scalar_lea.hbm %s3509_s28, 512 }
  0x73   :  { %p2921_p12 = scmp.ne.s32.totalorder %s3509_s28, %s2920_s21  ;;  %p2924_p13 = scmp.lt.u32.totalorder %s2920_s21, %s3509_s28 }
  0x75   :  { %p2926_p0 = pnand %p2924_p13, %p2921_p12 }
  0x77   :  { %2929 = shalt.err (!%p2926_p0)
}
  0x78   :  { %s2930_s22 = scalar_lea.vmem %s61_s8, 512  ;;  %p2935_p2 = scmp.lt.s32.totalorder %s61_s8, %s61_s8 }
  0x79   :  { %p2931_p1 = scmp.ne.s32.totalorder %s61_s8, %s2930_s22  ;;  %p2936_p3 = scmp.lt.s32.totalorder %s2930_s22, %s2930_s22 }
  0x7b   :  { %p2937_p4 = por %p2936_p3, %p2935_p2 }
  0x7d   :  { %p2938_p5 = pnand %p2937_p4, %p2931_p1 }
  0x7f   :  { %2941 = shalt.err (!%p2938_p5)
}
  0x80   :  { %s3510_s27 = smov 8   ;;  %s3511_s12 = smov 128  }
  0x81   :  { %66 = dma.hbm_to_vmem [thread:$0]  %s3509_s28, 512, %s61_s8, [#allocation6], %s3511_s12, %s3511_s12, %s3510_s27  }
  0x82   :  { %s2942_s26 = scalar_lea.hbm %s3482_s6, 2048 }
  0x83   :  { %p2943_p6 = scmp.ne.s32.totalorder %s3482_s6, %s2942_s26  ;;  %p2946_p7 = scmp.lt.u32.totalorder %s2942_s26, %s3482_s6 }
  0x85   :  { %p2948_p8 = pnand %p2946_p7, %p2943_p6 }
  0x87   :  { %2951 = shalt.err (!%p2948_p8)
}
  0x88   :  { %s2952_s25 = scalar_lea.vmem %s89_s30, 2048  ;;  %p2957_p10 = scmp.lt.s32.totalorder %s89_s30, %s89_s30 }
  0x89   :  { %p2953_p9 = scmp.ne.s32.totalorder %s89_s30, %s2952_s25  ;;  %p2958_p11 = scmp.lt.s32.totalorder %s2952_s25, %s2952_s25 }
  0x8b   :  { %p2959_p12 = por %p2958_p11, %p2957_p10 }
  0x8d   :  { %p2960_p13 = pnand %p2959_p12, %p2953_p9 }
  0x8f   :  { %2963 = shalt.err (!%p2960_p13)
}
  0x90   :  { %94 = dma.hbm_to_vmem [thread:$0]  %s3482_s6, 2048, %s89_s30, [#allocation9], %s3099_s20, %s3099_s20, %s3100_s4  }
  0x91   :  { %s3103_s22 = smov [#allocation13]   ;;  %s3104_s3 = smov [#allocation16]  }
  0x92   :  { %s116_s0 = sshll.u32 %s3103_s22, 4  ;;  %s144_s29 = sshll.u32 %s3104_s3, 4  ;;  %s117_s0 = int_to_ptr.vmem [resolvable:$true] %s116_s0  ;;  %s145_s29 = int_to_ptr.vmem [resolvable:$true] %s144_s29 }
  0x93   :  { %s2964_s21 = scalar_lea.hbm %s3486_s10, 4096 }
  0x94   :  { %p2965_p0 = scmp.ne.s32.totalorder %s3486_s10, %s2964_s21  ;;  %p2968_p1 = scmp.lt.u32.totalorder %s2964_s21, %s3486_s10 }
  0x96   :  { %p2970_p2 = pnand %p2968_p1, %p2965_p0 }
  0x98   :  { %2973 = shalt.err (!%p2970_p2)
}
  0x99   :  { %s2974_s6 = scalar_lea.vmem %s117_s0, 4096  ;;  %p2979_p4 = scmp.lt.s32.totalorder %s117_s0, %s117_s0 }
  0x9a   :  { %p2975_p3 = scmp.ne.s32.totalorder %s117_s0, %s2974_s6  ;;  %p2980_p5 = scmp.lt.s32.totalorder %s2974_s6, %s2974_s6 }
  0x9c   :  { %p2981_p6 = por %p2980_p5, %p2979_p4 }
  0x9e   :  { %p2982_p7 = pnand %p2981_p6, %p2975_p3 }
  0xa0   :  { %2985 = shalt.err (!%p2982_p7)
}
  0xa1   :  { %122 = dma.hbm_to_vmem [thread:$0]  %s3486_s10, 4096, %s117_s0, [#allocation12], %s3511_s12, %s3511_s12, %s3510_s27  }
  0xa2   :  { %s2986_s3 = scalar_lea.hbm %s3490_s14, 4096 }
  0xa3   :  { %p2987_p8 = scmp.ne.s32.totalorder %s3490_s14, %s2986_s3  ;;  %p2990_p9 = scmp.lt.u32.totalorder %s2986_s3, %s3490_s14 }
  0xa5   :  { %p2992_p10 = pnand %p2990_p9, %p2987_p8 }
  0xa7   :  { %2995 = shalt.err (!%p2992_p10)
}
  0xa8   :  { %s2996_s23 = scalar_lea.vmem %s145_s29, 4096  ;;  %p3001_p12 = scmp.lt.s32.totalorder %s145_s29, %s145_s29 }
  0xa9   :  { %p2997_p11 = scmp.ne.s32.totalorder %s145_s29, %s2996_s23  ;;  %p3002_p13 = scmp.lt.s32.totalorder %s2996_s23, %s2996_s23 }
  0xab   :  { %p3003_p0 = por %p3002_p13, %p3001_p12 }
  0xad   :  { %p3004_p1 = pnand %p3003_p0, %p2997_p11 }
  0xaf   :  { %3007 = shalt.err (!%p3004_p1)
}
  0xb0   :  { %150 = dma.hbm_to_vmem [thread:$0]  %s3490_s14, 4096, %s145_s29, [#allocation15], %s3511_s12, %s3511_s12, %s3510_s27  }
  0xb1   :  { %s3105_s24 = smov [#allocation17]   ;;  %s3008_s8 = scalar_lea.hbm %s3492_s16, 2048 }
  0xb2   :  { %s158_s25 = sshll.u32 %s3105_s24, 4  ;;  %p3009_p2 = scmp.ne.s32.totalorder %s3492_s16, %s3008_s8  ;;  %s159_s25 = int_to_ptr.vmem [resolvable:$true] %s158_s25 }
  0xb3   :  { %p3012_p3 = scmp.lt.u32.totalorder %s3008_s8, %s3492_s16 }
  0xb5   :  { %p3014_p4 = pnand %p3012_p3, %p3009_p2 }
  0xb7   :  { %3017 = shalt.err (!%p3014_p4)
}
  0xb8   :  { %s3018_s26 = scalar_lea.vmem %s159_s25, 2048  ;;  %p3023_p6 = scmp.lt.s32.totalorder %s159_s25, %s159_s25 }
  0xb9   :  { %p3019_p5 = scmp.ne.s32.totalorder %s159_s25, %s3018_s26  ;;  %p3024_p7 = scmp.lt.s32.totalorder %s3018_s26, %s3018_s26 }
  0xbb   :  { %p3025_p8 = por %p3024_p7, %p3023_p6 }
  0xbd   :  { %p3026_p9 = pnand %p3025_p8, %p3019_p5 }
  0xbf   :  { %3029 = shalt.err (!%p3026_p9)
}
  0xc0   :  { %164 = dma.hbm_to_vmem [thread:$0]  %s3492_s16, 2048, %s159_s25, [#allocation18], %s3099_s20, %s3099_s20, %s3100_s4  }
  0xc1   :  { %3074 = dma.done.wait [#allocation3], 256  }
  0xc2   :  { %3075 = vsyncadd [#allocation3], 4294967040 }
  0xc3   :  { %3076 = dma.done.wait [#allocation6], 640  }
  0xc4   :  { %3077 = vsyncadd [#allocation6], 4294966656 }
  0xc5   :  { %3078 = dma.done.wait [#allocation9], 6144  }
  0xc6   :  { %3079 = vsyncadd [#allocation9], 4294961152 }
  0xc7   :  { %3080 = dma.done.wait [#allocation12], 8192  }
  0xc8   :  { %3081 = vsyncadd [#allocation12], 4294959104 }
  0xc9   :  { %3082 = dma.done.wait [#allocation15], 6144  }
  0xca   :  { %3083 = vsyncadd [#allocation15], 4294961152 }
  0xcb   :  { %3084 = dma.done.wait [#allocation18], 2048  }
  0xcc   :  { %3085 = vsyncadd [#allocation18], 4294965248  ;;  %v3106_v0 = vmov 0   ;;  %v2434_v1 = vld [vmem:[#allocation7 + $0x4] ss:$8 sps:$4 sm:$0xff]   ;;  %vm250_vm0 = vcmask 261120   ;;  %v210_v45 = vlaneseq }
  0xcd   :  { %289 = vmatprep.mubr.bf16.mxu0 %v3106_v0  ;;  %v2436_v2 = vld [vmem:[#allocation7] ss:$8 sps:$4 sm:$0xff]   ;;  %257 = vmatprep.subr.bf16.mxu0 %v2434_v1  ;;  %v2437_v3 = vld [vmem:[#allocation7 + $0x14] ss:$8 sps:$4 sm:$0xff]   ;;  %v2439_v4 = vld [vmem:[#allocation7 + $0x10] ss:$8 sps:$4 sm:$0xff]  }
  0xce   :  { %258 = vmatpush1.bf16.msra.mxu0 %v2436_v2  ;;  %v2440_v5 = vld [vmem:[#allocation2] sm:$0xff]   ;;  %v2445_v8 = vld [vmem:[#allocation8 + $0x14] ss:$8 sps:$4 sm:$0xff]   ;;  %v2447_v9 = vld [vmem:[#allocation8 + $0x10] ss:$8 sps:$4 sm:$0xff]   ;;  %v3357_v46 = vshrl.u32 %v210_v45, 7 }
  0xcf   :  { %259 = vmatprep.subr.bf16.mxu0 %v2437_v3  ;;  %v2442_v6 = vld [vmem:[#allocation8 + $0x4] ss:$8 sps:$4 sm:$0xff]   ;;  %v2444_v7 = vld [vmem:[#allocation8] ss:$8 sps:$4 sm:$0xff]   ;;  %v2451_v12 = vld [vmem:[#allocation8 + $0x34] ss:$8 sps:$4 sm:$0xff]  }
  0xd0   :  { %526 = vmatprep.subr.bf16.mxu1 %v2442_v6  ;;  %v2448_v10 = vld [vmem:[#allocation8 + $0x24] ss:$8 sps:$4 sm:$0xff]   ;;  %v2450_v11 = vld [vmem:[#allocation8 + $0x20] ss:$8 sps:$4 sm:$0xff]   ;;  %v2441_v13 = vld [vmem:[#allocation2 + $0x8] sm:$0xff]   ;;  %v3360_v47 = vsub.s32 0, %v3357_v46 }
  0xd1   :  { %527 = vmatpush1.bf16.msra.mxu1 %v2444_v7  ;;  %v2453_v14 = vld [vmem:[#allocation8 + $0x30] ss:$8 sps:$4 sm:$0xff]   ;;  %v2454_v15 = vld [vmem:[#allocation8 + $0x44] ss:$8 sps:$4 sm:$0xff]   ;;  %v2456_v16 = vld [vmem:[#allocation8 + $0x40] ss:$8 sps:$4 sm:$0xff]  }
  0xd2   :  { %260 = vmatpush1.bf16.msra.mxu0 %v2439_v4  ;;  %528 = vmatprep.subr.bf16.mxu1 %v2445_v8  ;;  %v2457_v17 = vld [vmem:[#allocation8 + $0x54] ss:$8 sps:$4 sm:$0xff]   ;;  %v2459_v18 = vld [vmem:[#allocation8 + $0x50] ss:$8 sps:$4 sm:$0xff]   ;;  %v2460_v19 = vld [vmem:[#allocation8 + $0x64] ss:$8 sps:$4 sm:$0xff]  }
  0xd3   :  { %v2462_v20 = vld [vmem:[#allocation8 + $0x60] ss:$8 sps:$4 sm:$0xff]   ;;  %v2463_v21 = vld [vmem:[#allocation8 + $0x74] ss:$8 sps:$4 sm:$0xff]   ;;  %v2465_v22 = vld [vmem:[#allocation8 + $0x70] ss:$8 sps:$4 sm:$0xff]  }
  0xd4   :  { %v2466_v23 = vld [vmem:[#allocation8 + $0x84] ss:$8 sps:$4 sm:$0xff]   ;;  %v2468_v24 = vld [vmem:[#allocation8 + $0x80] ss:$8 sps:$4 sm:$0xff]   ;;  %v2469_v25 = vld [vmem:[#allocation8 + $0x94] ss:$8 sps:$4 sm:$0xff]  }
  0xd5   :  { %2146 = vmatmul.mubr.msk.bf16.vlgmr.msra.gmra.mrb[0].mxu0 %vm250_vm0, %v2440_v5  ;;  %529 = vmatpush1.bf16.msra.mxu1 %v2447_v9  ;;  %v2471_v26 = vld [vmem:[#allocation8 + $0x90] ss:$8 sps:$4 sm:$0xff]   ;;  %v2472_v27 = vld [vmem:[#allocation8 + $0xa4] ss:$8 sps:$4 sm:$0xff]   ;;  %v2474_v28 = vld [vmem:[#allocation8 + $0xa0] ss:$8 sps:$4 sm:$0xff]  }
  0xd6   :  { %299 = vmatprep.mubr.bf16.mxu0 %v3106_v0  ;;  %530 = vmatprep.subr.bf16.mxu1 %v2448_v10  ;;  %v2475_v29 = vld [vmem:[#allocation8 + $0xb4] ss:$8 sps:$4 sm:$0xff]   ;;  %v2477_v30 = vld [vmem:[#allocation8 + $0xb0] ss:$8 sps:$4 sm:$0xff]   ;;  %v2478_v31 = vld [vmem:[#allocation8 + $0xc4] ss:$8 sps:$4 sm:$0xff]  }
  0xd7   :  { %v2480_v32 = vld [vmem:[#allocation8 + $0xc0] ss:$8 sps:$4 sm:$0xff]   ;;  %v2481_v33 = vld [vmem:[#allocation8 + $0xd4] ss:$8 sps:$4 sm:$0xff]   ;;  %v2483_v34 = vld [vmem:[#allocation8 + $0xd0] ss:$8 sps:$4 sm:$0xff]  }
  0xd8   :  { %v2484_v35 = vld [vmem:[#allocation8 + $0xe4] ss:$8 sps:$4 sm:$0xff]   ;;  %v2486_v36 = vld [vmem:[#allocation8 + $0xe0] ss:$8 sps:$4 sm:$0xff]   ;;  %v2487_v37 = vld [vmem:[#allocation8 + $0xf4] ss:$8 sps:$4 sm:$0xff]  }
  0xd9   :  { %531 = vmatpush1.bf16.msra.mxu1 %v2450_v11  ;;  %v2489_v38 = vld [vmem:[#allocation8 + $0xf0] ss:$8 sps:$4 sm:$0xff]   ;;  %v2490_v39 = vld [vmem:[#allocation10 + $0x40] sm:$0xff]   ;;  %v2492_v41 = vld [vmem:[#allocation10 + $0x48] sm:$0xff]   ;;  %s3512_s4 = sld [smem:[#allocation33_spill]]  ;;  %v3366_v49 = vsub.s32 1, %v3357_v46 }
  0xda   :  { %532 = vmatprep.subr.bf16.mxu1 %v2451_v12  ;;  %v2491_v40 = vld [vmem:[#allocation10] sm:$0xff]   ;;  %2331 = vmatprep.subr.bf16.mxu0 %v2490_v39  ;;  %v2493_v42 = vld [vmem:[#allocation10 + $0x8] sm:$0xff]   ;;  %v2494_v43 = vld [vmem:[#allocation10 + $0x50] sm:$0xff]  }
  0xdb   :  { %2332 = vmatpush3.bf16.msra.mxu0 %v2491_v40  ;;  %v2495_v44 = vld [vmem:[#allocation10 + $0x10] sm:$0xff]  }
  0xdc   :  { %2333 = vmatprep.subr.bf16.mxu0 %v2492_v41 }
  0xdd   :  { %2147 = vmatmul.mubr.msk.bf16.gmra.mrb[4].mxu0 %vm250_vm0, %v2441_v13  ;;  %533 = vmatpush1.bf16.msra.mxu1 %v2453_v14 }
  0xde   :  { %534 = vmatprep.subr.bf16.mxu1 %v2454_v15 }
  0xdf   :  { %2334 = vmatpush3.bf16.msra.mxu0 %v2493_v42  ;;  %v208_v48 = vld [vmem:[%s3512_s4] sm:$0x3] }
  0xe0   :  { %2335 = vmatprep.subr.bf16.mxu0 %v2494_v43  ;;  %v213_v50 = vrot.slane %v208_v48, %v3360_v47  ;;  %v217_v51 = vrot.slane %v208_v48, %v3366_v49 }
  0xe1   :  { %535 = vmatpush1.bf16.msra.mxu1 %v2456_v16 }
  0xe2   :  { %536 = vmatprep.subr.bf16.mxu1 %v2457_v17  ;;  %v2496_v17 = vld [vmem:[#allocation10 + $0x58] sm:$0xff]  }
  0xe3   :  { %2336 = vmatpush3.bf16.msra.mxu0 %v2495_v44 }
  0xe4   :  { %2337 = vmatprep.subr.bf16.mxu0 %v2496_v17  ;;  %v2533_v17 = vld [vmem:[#allocation11 + $0x88] ss:$16 sps:$4 sm:$0xff]  }
  0xe5   :  { %537 = vmatpush1.bf16.msra.mxu1 %v2459_v18  ;;  %v2497_v18 = vld [vmem:[#allocation10 + $0x18] sm:$0xff]  }
  0xe6   :  { %538 = vmatprep.subr.bf16.mxu1 %v2460_v19  ;;  %v2498_v19 = vld [vmem:[#allocation10 + $0x60] sm:$0xff]  }
  0xe7   :  { %2338 = vmatpush3.bf16.msra.mxu0 %v2497_v18  ;;  %v2538_v18 = vld [vmem:[#allocation11 + $0xa4] ss:$16 sps:$4 sm:$0xff]  }
  0xe8   :  { %2339 = vmatprep.subr.bf16.mxu0 %v2498_v19  ;;  %v2541_v19 = vld [vmem:[#allocation11 + $0xac] ss:$16 sps:$4 sm:$0xff]  }
  0xe9   :  { %539 = vmatpush1.bf16.msra.mxu1 %v2462_v20  ;;  %v2499_v20 = vld [vmem:[#allocation10 + $0x20] sm:$0xff]  }
  0xea   :  { %540 = vmatprep.subr.bf16.mxu1 %v2463_v21  ;;  %v2500_v21 = vld [vmem:[#allocation10 + $0x68] sm:$0xff]  }
  0xeb   :  { %2340 = vmatpush3.bf16.msra.mxu0 %v2499_v20  ;;  %v2536_v20 = vld [vmem:[#allocation11 + $0xa0] ss:$16 sps:$4 sm:$0xff]  }
  0xec   :  { %2341 = vmatprep.subr.bf16.mxu0 %v2500_v21  ;;  %v2539_v21 = vld [vmem:[#allocation11 + $0xa8] ss:$16 sps:$4 sm:$0xff]  }
  0xed   :  { %541 = vmatpush1.bf16.msra.mxu1 %v2465_v22  ;;  %v2501_v22 = vld [vmem:[#allocation10 + $0x28] sm:$0xff]  }
  0xee   :  { %542 = vmatprep.subr.bf16.mxu1 %v2466_v23  ;;  %v2502_v23 = vld [vmem:[#allocation10 + $0x70] sm:$0xff]  }
  0xef   :  { %2342 = vmatpush3.bf16.msra.mxu0 %v2501_v22  ;;  %v2544_v22 = vld [vmem:[#allocation11 + $0xc4] ss:$16 sps:$4 sm:$0xff]  }
  0xf0   :  { %2343 = vmatprep.subr.bf16.mxu0 %v2502_v23  ;;  %v2547_v23 = vld [vmem:[#allocation11 + $0xcc] ss:$16 sps:$4 sm:$0xff]  }
  0xf1   :  { %543 = vmatpush1.bf16.msra.mxu1 %v2468_v24  ;;  %v2503_v24 = vld [vmem:[#allocation10 + $0x30] sm:$0xff]  }
  0xf2   :  { %544 = vmatprep.subr.bf16.mxu1 %v2469_v25  ;;  %v2504_v25 = vld [vmem:[#allocation10 + $0x78] sm:$0xff]  }
  0xf3   :  { %2344 = vmatpush3.bf16.msra.mxu0 %v2503_v24  ;;  %v2542_v24 = vld [vmem:[#allocation11 + $0xc0] ss:$16 sps:$4 sm:$0xff]  }
  0xf4   :  { %2345 = vmatprep.subr.bf16.mxu0 %v2504_v25  ;;  %v2545_v25 = vld [vmem:[#allocation11 + $0xc8] ss:$16 sps:$4 sm:$0xff]  }
  0xf5   :  { %545 = vmatpush1.bf16.msra.mxu1 %v2471_v26  ;;  %v2505_v26 = vld [vmem:[#allocation10 + $0x38] sm:$0xff]  }
  0xf6   :  { %546 = vmatprep.subr.bf16.mxu1 %v2472_v27  ;;  %v2508_v27 = vld [vmem:[#allocation11 + $0x4] ss:$16 sps:$4 sm:$0xff]  }
  0xf7   :  { %2346 = vmatpush3.bf16.msra.mxu0 %v2505_v26  ;;  %v2550_v26 = vld [vmem:[#allocation11 + $0xe4] ss:$16 sps:$4 sm:$0xff]  }
  0xf8   :  { %995 = vmatprep.subr.bf16.mxu0 %v2508_v27  ;;  %v2553_v27 = vld [vmem:[#allocation11 + $0xec] ss:$16 sps:$4 sm:$0xff]  }
  0xf9   :  { %547 = vmatpush1.bf16.msra.mxu1 %v2474_v28  ;;  %v2509_v28 = vld [vmem:[#allocation11 + $0x8] ss:$16 sps:$4 sm:$0xff]  }
  0xfa   :  { %548 = vmatprep.subr.bf16.mxu1 %v2475_v29  ;;  %v2511_v29 = vld [vmem:[#allocation11 + $0xc] ss:$16 sps:$4 sm:$0xff]  }
  0xfd   :  { %549 = vmatpush1.bf16.msra.mxu1 %v2477_v30  ;;  %v2517_v30 = vld [vmem:[#allocation11 + $0x2c] ss:$16 sps:$4 sm:$0xff]  }
  0xfe   :  { %550 = vmatprep.subr.bf16.mxu1 %v2478_v31  ;;  %v2515_v31 = vld [vmem:[#allocation11 + $0x28] ss:$16 sps:$4 sm:$0xff]  }
 0x101   :  { %551 = vmatpush1.bf16.msra.mxu1 %v2480_v32  ;;  %v2523_v32 = vld [vmem:[#allocation11 + $0x4c] ss:$16 sps:$4 sm:$0xff]  }
 0x102   :  { %552 = vmatprep.subr.bf16.mxu1 %v2481_v33  ;;  %v2521_v33 = vld [vmem:[#allocation11 + $0x48] ss:$16 sps:$4 sm:$0xff]  }
 0x105   :  { %553 = vmatpush1.bf16.msra.mxu1 %v2483_v34  ;;  %v354_v34 = vld [vmem:[%s3481_s5] sm:$0x3] }
 0x106   :  { %554 = vmatprep.subr.bf16.mxu1 %v2484_v35  ;;  %v359_v35 = vrot.slane %v354_v34, %v3360_v47 }
 0x109   :  { %555 = vmatpush1.bf16.msra.mxu1 %v2486_v36  ;;  %v363_v36 = vrot.slane %v354_v34, %v3366_v49 }
 0x10a   :  { %556 = vmatprep.subr.bf16.mxu1 %v2487_v37 }
 0x10d   :  { %557 = vmatpush1.bf16.msra.mxu1 %v2489_v38 }
 0x10e   :  { %1048 = vmatprep.subr.bf16.mxu1 %v2511_v29  ;;  %v2551_v29 = vld [vmem:[#allocation11 + $0xe8] ss:$16 sps:$4 sm:$0xff]  }
 0x1a8   :  { %v291_v52 = vpop.f32.mrb[0].mxu0 }
 0x1a9   :  { %v292_v53 = vadd.f32 %v291_v52, %v213_v50  ;;  %v293_v54 = vpop.f32.mrb[1].mxu0 }
 0x1aa   :  { %v294_v55 = vadd.f32 %v293_v54, %v217_v51  ;;  %v295_v56 = vpop.f32.mrb[2].mxu0 }
 0x1ab   :  { %2682 = vtanh.f32 %v292_v53  ;;  %v296_v57 = vadd.f32 %v295_v56, %v213_v50  ;;  %v297_v58 = vpop.f32.mrb[3].mxu0 }
 0x1ac   :  { %2684 = vtanh.f32 %v294_v55  ;;  %v298_v59 = vadd.f32 %v297_v58, %v217_v51 }
 0x1ad   :  { %2686 = vtanh.f32 %v296_v57 }
 0x1ae   :  { %2688 = vtanh.f32 %v298_v59 }
 0x1b0   :  { %v301_v60 = vpop.f32.mrb[4].mxu0 }
 0x1b1   :  { %v302_v61 = vadd.f32 %v301_v60, %v213_v50  ;;  %v303_v62 = vpop.f32.mrb[5].mxu0 }
 0x1b2   :  { %v304_v63 = vadd.f32 %v303_v62, %v217_v51  ;;  %v305_v1 = vpop.f32.mrb[6].mxu0  ;;  %v2506_v62 = vld [vmem:[#allocation11] ss:$16 sps:$4 sm:$0xff]  }
 0x1b3   :  { %2690 = vtanh.f32 %v302_v61  ;;  %v306_v2 = vadd.f32 %v305_v1, %v213_v50  ;;  %v307_v3 = vpop.f32.mrb[7].mxu0 }
 0x1b4   :  { %2692 = vtanh.f32 %v304_v63  ;;  %v308_v4 = vadd.f32 %v307_v3, %v217_v51  ;;  %v2514_v63 = vld [vmem:[#allocation11 + $0x24] ss:$16 sps:$4 sm:$0xff]  }
 0x1b5   :  { %v2683_v5 = vpop.eup %2682  ;;  %2694 = vtanh.f32 %v306_v2  ;;  %v2512_v2 = vld [vmem:[#allocation11 + $0x20] ss:$16 sps:$4 sm:$0xff]  }
 0x1b6   :  { %v2685_v6 = vpop.eup %2684  ;;  %2696 = vtanh.f32 %v308_v4  ;;  %v2520_v4 = vld [vmem:[#allocation11 + $0x44] ss:$16 sps:$4 sm:$0xff]  }
 0x1b7   :  { %v2687_v7 = vpop.eup %2686 }
 0x1b8   :  { %v2689_v8 = vpop.eup %2688  ;;  %v318_v9 = vpack.c.bf16 %v2687_v7, %v2683_v5 }
 0x1b9   :  { %v319_v10 = vpack.c.bf16 %v2689_v8, %v2685_v6 }
 0x1bb   :  { %558 = vmatprep.mubr.bf16.mxu1 %v319_v10  ;;  %v2526_v10 = vld [vmem:[#allocation11 + $0x64] ss:$16 sps:$4 sm:$0xff]  }
 0x1bc   :  { %559 = vmatmul.mubr.bf16.vlgmr.msra.gmra.mrb[0].mxu1 %v318_v9  ;;  %v2518_v9 = vld [vmem:[#allocation11 + $0x40] ss:$16 sps:$4 sm:$0xff]  }
 0x1bd   :  { %v2691_v11 = vpop.eup %2690  ;;  %1049 = vmatpush1.bf16.msra.mxu1 %v2509_v28  ;;  %v2548_v28 = vld [vmem:[#allocation11 + $0xe0] ss:$16 sps:$4 sm:$0xff]  }
 0x1be   :  { %v2693_v12 = vpop.eup %2692  ;;  %1050 = vmatprep.subr.bf16.mxu1 %v2517_v30  ;;  %v2556_v30 = vld [vmem:[#allocation13 + $0x4] ss:$8 sps:$4 sm:$0xff]  }
 0x1bf   :  { %v2695_v13 = vpop.eup %2694 }
 0x1c0   :  { %v2697_v14 = vpop.eup %2696  ;;  %v320_v15 = vpack.c.bf16 %v2695_v13, %v2691_v11  ;;  %v2529_v11 = vld [vmem:[#allocation11 + $0x6c] ss:$16 sps:$4 sm:$0xff]   ;;  %v2527_v13 = vld [vmem:[#allocation11 + $0x68] ss:$16 sps:$4 sm:$0xff]  }
 0x1c1   :  { %v321_v16 = vpack.c.bf16 %v2697_v14, %v2693_v12  ;;  %1051 = vmatpush1.bf16.msra.mxu1 %v2515_v31  ;;  %v2524_v12 = vld [vmem:[#allocation11 + $0x60] ss:$16 sps:$4 sm:$0xff]   ;;  %v2532_v14 = vld [vmem:[#allocation11 + $0x84] ss:$16 sps:$4 sm:$0xff]  }
 0x1c2   :  { %1052 = vmatprep.subr.bf16.mxu1 %v2523_v32  ;;  %v2180_v32 = vld [vmem:[%s3483_s7] ss:$0 sm:$0xff] }
 0x1c3   :  { %568 = vmatprep.mubr.bf16.mxu1 %v321_v16  ;;  %v2530_v16 = vld [vmem:[#allocation11 + $0x80] ss:$16 sps:$4 sm:$0xff]  }
 0x1c4   :  { %569 = vmatmul.mubr.bf16.gmra.mrb[4].mxu1 %v320_v15  ;;  %v2535_v15 = vld [vmem:[#allocation11 + $0x8c] ss:$16 sps:$4 sm:$0xff]  }
 0x1c5   :  { %1080 = vmatprep.mubr.bf16.mxu1 %v3106_v0  ;;  %1053 = vmatpush1.bf16.msra.mxu1 %v2521_v33 }
 0x1c6   :  { %1054 = vmatprep.subr.bf16.mxu1 %v2529_v11  ;;  %v2583_v11 = vld [vmem:[#allocation13 + $0x94] ss:$8 sps:$4 sm:$0xff]  }
 0x1c9   :  { %1055 = vmatpush1.bf16.msra.mxu1 %v2527_v13  ;;  %v2586_v13 = vld [vmem:[#allocation13 + $0xa4] ss:$8 sps:$4 sm:$0xff]  }
 0x1ca   :  { %1056 = vmatprep.subr.bf16.mxu1 %v2535_v15  ;;  %v2589_v15 = vld [vmem:[#allocation13 + $0xb4] ss:$8 sps:$4 sm:$0xff]  }
 0x1cd   :  { %1057 = vmatpush1.bf16.msra.mxu1 %v2533_v17  ;;  %v2592_v17 = vld [vmem:[#allocation13 + $0xc4] ss:$8 sps:$4 sm:$0xff]  }
 0x1ce   :  { %1058 = vmatprep.subr.bf16.mxu1 %v2541_v19  ;;  %v2595_v19 = vld [vmem:[#allocation13 + $0xd4] ss:$8 sps:$4 sm:$0xff]  }
 0x1d1   :  { %1059 = vmatpush1.bf16.msra.mxu1 %v2539_v21  ;;  %v2596_v21 = vld [vmem:[#allocation13 + $0xe0] ss:$8 sps:$4 sm:$0xff]  }
 0x1d2   :  { %1060 = vmatprep.subr.bf16.mxu1 %v2547_v23  ;;  %v2601_v23 = vld [vmem:[#allocation13 + $0xf4] ss:$8 sps:$4 sm:$0xff]  }
 0x1d5   :  { %1061 = vmatpush1.bf16.msra.mxu1 %v2545_v25  ;;  %v2602_v25 = vld [vmem:[#allocation14 + $0x40] sm:$0xff]  }
 0x1d6   :  { %1062 = vmatprep.subr.bf16.mxu1 %v2553_v27  ;;  %v2604_v27 = vld [vmem:[#allocation14 + $0x48] sm:$0xff]  }
 0x1d9   :  { %1063 = vmatpush1.bf16.msra.mxu1 %v2551_v29  ;;  %v2606_v29 = vld [vmem:[#allocation14 + $0x50] sm:$0xff]  }
 0x1da   :  { %2359 = vmatprep.subr.bf16.mxu1 %v2602_v25 }
 0x28f   :  { %v560_v37 = vpop.f32.mrb[0].mxu1 }
 0x290   :  { %v561_v38 = vadd.f32 %v560_v37, %v359_v35  ;;  %v562_v39 = vpop.f32.mrb[1].mxu1 }
 0x291   :  { %v563_v40 = vadd.f32 %v562_v39, %v363_v36  ;;  %v564_v41 = vpop.f32.mrb[2].mxu1 }
 0x292   :  { %2698 = vtanh.f32 %v561_v38  ;;  %v565_v42 = vadd.f32 %v564_v41, %v359_v35  ;;  %v566_v43 = vpop.f32.mrb[3].mxu1 }
 0x293   :  { %2700 = vtanh.f32 %v563_v40  ;;  %v567_v44 = vadd.f32 %v566_v43, %v363_v36 }
 0x294   :  { %2702 = vtanh.f32 %v565_v42 }
 0x295   :  { %2704 = vtanh.f32 %v567_v44 }
 0x297   :  { %v570_v45 = vpop.f32.mrb[4].mxu1 }
 0x298   :  { %v571_v48 = vadd.f32 %v570_v45, %v359_v35  ;;  %v572_v50 = vpop.f32.mrb[5].mxu1 }
 0x299   :  { %v573_v51 = vadd.f32 %v572_v50, %v363_v36  ;;  %v574_v52 = vpop.f32.mrb[6].mxu1 }
 0x29a   :  { %2706 = vtanh.f32 %v571_v48  ;;  %v575_v53 = vadd.f32 %v574_v52, %v359_v35  ;;  %v576_v54 = vpop.f32.mrb[7].mxu1 }
 0x29b   :  { %2708 = vtanh.f32 %v573_v51  ;;  %v577_v55 = vadd.f32 %v576_v54, %v363_v36  ;;  %v2554_v54 = vld [vmem:[#allocation13] ss:$8 sps:$4 sm:$0xff]  }
 0x29c   :  { %v2699_v56 = vpop.eup %2698  ;;  %2710 = vtanh.f32 %v575_v53 }
 0x29d   :  { %v2701_v57 = vpop.eup %2700  ;;  %2712 = vtanh.f32 %v577_v55  ;;  %v2559_v55 = vld [vmem:[#allocation13 + $0x14] ss:$8 sps:$4 sm:$0xff]  }
 0x29e   :  { %v2703_v58 = vpop.eup %2702 }
 0x29f   :  { %v2705_v59 = vpop.eup %2704  ;;  %v587_v60 = vpack.c.bf16 %v2703_v58, %v2699_v56  ;;  %v2557_v56 = vld [vmem:[#allocation13 + $0x10] ss:$8 sps:$4 sm:$0xff]   ;;  %v2562_v58 = vld [vmem:[#allocation13 + $0x24] ss:$8 sps:$4 sm:$0xff]  }
 0x2a0   :  { %v588_v61 = vpack.c.bf16 %v2705_v59, %v2701_v57 }
 0x2a2   :  { %758 = vmatprep.mubr.bf16.mxu0 %v588_v61  ;;  %v2560_v61 = vld [vmem:[#allocation13 + $0x20] ss:$8 sps:$4 sm:$0xff]  }
 0x2a3   :  { %759 = vmatmul.mubr.bf16.vlgmr.msra.gmra.mrb[8].mxu0 %v587_v60 }
 0x2a4   :  { %v2707_v1 = vpop.eup %2706  ;;  %996 = vmatpush1.bf16.msra.mxu0 %v2506_v62  ;;  %v2565_v62 = vld [vmem:[#allocation13 + $0x34] ss:$8 sps:$4 sm:$0xff]  }
 0x2a5   :  { %v2709_v3 = vpop.eup %2708  ;;  %997 = vmatprep.subr.bf16.mxu0 %v2514_v63  ;;  %v2563_v63 = vld [vmem:[#allocation13 + $0x30] ss:$8 sps:$4 sm:$0xff]  }
 0x2a6   :  { %v2711_v5 = vpop.eup %2710 }
 0x2a7   :  { %v2713_v6 = vpop.eup %2712  ;;  %v589_v7 = vpack.c.bf16 %v2711_v5, %v2707_v1  ;;  %v2568_v1 = vld [vmem:[#allocation13 + $0x44] ss:$8 sps:$4 sm:$0xff]  }
 0x2a8   :  { %v590_v8 = vpack.c.bf16 %v2713_v6, %v2709_v3  ;;  %998 = vmatpush1.bf16.msra.mxu0 %v2512_v2  ;;  %v2566_v2 = vld [vmem:[#allocation13 + $0x40] ss:$8 sps:$4 sm:$0xff]   ;;  %v2571_v3 = vld [vmem:[#allocation13 + $0x54] ss:$8 sps:$4 sm:$0xff]   ;;  %v2574_v5 = vld [vmem:[#allocation13 + $0x64] ss:$8 sps:$4 sm:$0xff]  }
 0x2a9   :  { %999 = vmatprep.subr.bf16.mxu0 %v2520_v4  ;;  %v2569_v4 = vld [vmem:[#allocation13 + $0x50] ss:$8 sps:$4 sm:$0xff]   ;;  %v2572_v6 = vld [vmem:[#allocation13 + $0x60] ss:$8 sps:$4 sm:$0xff]  }
 0x2aa   :  { %766 = vmatprep.mubr.bf16.mxu0 %v590_v8  ;;  %v2575_v8 = vld [vmem:[#allocation13 + $0x70] ss:$8 sps:$4 sm:$0xff]  }
 0x2ab   :  { %767 = vmatmul.mubr.bf16.gmra.mrb[12].mxu0 %v589_v7  ;;  %v2577_v7 = vld [vmem:[#allocation13 + $0x74] ss:$8 sps:$4 sm:$0xff]  }
 0x2ac   :  { %1000 = vmatpush1.bf16.msra.mxu0 %v2518_v9  ;;  %1027 = vmatprep.mubr.bf16.mxu0 %v3106_v0  ;;  %v2580_v9 = vld [vmem:[#allocation13 + $0x84] ss:$8 sps:$4 sm:$0xff]  }
 0x2ad   :  { %1001 = vmatprep.subr.bf16.mxu0 %v2526_v10  ;;  %v2578_v10 = vld [vmem:[#allocation13 + $0x80] ss:$8 sps:$4 sm:$0xff]  }
 0x2b0   :  { %1002 = vmatpush1.bf16.msra.mxu0 %v2524_v12  ;;  %v2581_v12 = vld [vmem:[#allocation13 + $0x90] ss:$8 sps:$4 sm:$0xff]  }
 0x2b1   :  { %1003 = vmatprep.subr.bf16.mxu0 %v2532_v14  ;;  %v2584_v14 = vld [vmem:[#allocation13 + $0xa0] ss:$8 sps:$4 sm:$0xff]  }
 0x2b4   :  { %1004 = vmatpush1.bf16.msra.mxu0 %v2530_v16  ;;  %v2587_v16 = vld [vmem:[#allocation13 + $0xb0] ss:$8 sps:$4 sm:$0xff]  }
 0x2b5   :  { %1005 = vmatprep.subr.bf16.mxu0 %v2538_v18  ;;  %v2590_v18 = vld [vmem:[#allocation13 + $0xc0] ss:$8 sps:$4 sm:$0xff]  }
 0x2b8   :  { %1006 = vmatpush1.bf16.msra.mxu0 %v2536_v20  ;;  %v2593_v20 = vld [vmem:[#allocation13 + $0xd0] ss:$8 sps:$4 sm:$0xff]  }
 0x2b9   :  { %1007 = vmatprep.subr.bf16.mxu0 %v2544_v22  ;;  %v2598_v22 = vld [vmem:[#allocation13 + $0xe4] ss:$8 sps:$4 sm:$0xff]  }
 0x2bc   :  { %1008 = vmatpush1.bf16.msra.mxu0 %v2542_v24  ;;  %v2599_v24 = vld [vmem:[#allocation13 + $0xf0] ss:$8 sps:$4 sm:$0xff]  }
 0x2bd   :  { %1009 = vmatprep.subr.bf16.mxu0 %v2550_v26  ;;  %v2603_v26 = vld [vmem:[#allocation14] sm:$0xff]  }
 0x2c0   :  { %1010 = vmatpush1.bf16.msra.mxu0 %v2548_v28  ;;  %v2605_v28 = vld [vmem:[#allocation14 + $0x8] sm:$0xff]  }
 0x2c1   :  { %1329 = vmatprep.subr.bf16.mxu0 %v2556_v30  ;;  %v2607_v30 = vld [vmem:[#allocation14 + $0x10] sm:$0xff]  }
 0x376   :  { %v2347_v31 = vpop.f32.mrb[8].mxu0 }
 0x377   :  { %v2348_v33 = vpop.f32.mrb[9].mxu0 }
 0x378   :  { %v2349_v34 = vadd.f32 %v2348_v33, %v2347_v31  ;;  %v2350_v35 = vpop.f32.mrb[10].mxu0  ;;  %v2608_v31 = vld [vmem:[#allocation14 + $0x58] sm:$0xff]   ;;  %v813_v33 = vld [vmem:[%s3485_s9] sm:$0xf] }
 0x379   :  { %v2351_v36 = vpop.f32.mrb[11].mxu0 }
 0x37a   :  { %v761_v37 = vadd.f32 %v2349_v34, %v2180_v32  ;;  %v2352_v38 = vadd.f32 %v2351_v36, %v2350_v35  ;;  %v829_v34 = vsub.s32 3, %v3357_v46  ;;  %v818_v35 = vrot.slane %v813_v33, %v3360_v47 }
 0x37c   :  { %v764_v39 = vadd.f32 %v2352_v38, %v2180_v32  ;;  %2714 = vtanh.f32 %v761_v37  ;;  %v822_v37 = vrot.slane %v813_v33, %v3366_v49  ;;  %v830_v38 = vrot.slane %v813_v33, %v829_v34  ;;  %v2609_v34 = vld [vmem:[#allocation14 + $0x18] sm:$0xff]  }
 0x37e   :  { %2716 = vtanh.f32 %v764_v39  ;;  %v2353_v40 = vpop.f32.mrb[12].mxu0 }
 0x37f   :  { %v2354_v41 = vpop.f32.mrb[13].mxu0 }
 0x380   :  { %v2355_v42 = vadd.f32 %v2354_v41, %v2353_v40  ;;  %v2356_v43 = vpop.f32.mrb[14].mxu0 }
 0x381   :  { %v2357_v44 = vpop.f32.mrb[15].mxu0 }
 0x382   :  { %v769_v45 = vadd.f32 %v2355_v42, %v2180_v32  ;;  %v2358_v48 = vadd.f32 %v2357_v44, %v2356_v43 }
 0x384   :  { %2718 = vtanh.f32 %v769_v45  ;;  %v772_v50 = vadd.f32 %v2358_v48, %v2180_v32  ;;  %v825_v32 = vsub.s32 2, %v3357_v46 }
 0x386   :  { %2720 = vtanh.f32 %v772_v50  ;;  %v2715_v51 = vpop.eup %2714  ;;  %v826_v36 = vrot.slane %v813_v33, %v825_v32 }
 0x388   :  { %v2717_v52 = vpop.eup %2716 }
 0x389   :  { %v779_v53 = vpack.c.bf16 %v2717_v52, %v2715_v51 }
 0x38b   :  { %1028 = vmatmul.mubr.bf16.vlgmr.msra.gmra.mrb[16].mxu0 %v779_v53  ;;  %1081 = vmatmul.mubr.bf16.vlgmr.msra.gmra.mrb[8].mxu1 %v779_v53 }
 0x38c   :  { %1037 = vmatprep.mubr.bf16.mxu0 %v3106_v0  ;;  %1090 = vmatprep.mubr.bf16.mxu1 %v3106_v0 }
 0x38d   :  { %1330 = vmatpush1.bf16.msra.mxu0 %v2554_v54  ;;  %2360 = vmatpush3.bf16.msra.mxu1 %v2603_v26 }
 0x38e   :  { %v2719_v57 = vpop.eup %2718  ;;  %1331 = vmatprep.subr.bf16.mxu0 %v2559_v55  ;;  %2361 = vmatprep.subr.bf16.mxu1 %v2604_v27 }
 0x390   :  { %v2721_v59 = vpop.eup %2720 }
 0x391   :  { %v780_v60 = vpack.c.bf16 %v2721_v59, %v2719_v57  ;;  %1332 = vmatpush1.bf16.msra.mxu0 %v2557_v56  ;;  %2362 = vmatpush3.bf16.msra.mxu1 %v2605_v28 }
 0x392   :  { %1333 = vmatprep.subr.bf16.mxu0 %v2562_v58  ;;  %2363 = vmatprep.subr.bf16.mxu1 %v2606_v29 }
 0x393   :  { %1038 = vmatmul.mubr.bf16.gmra.mrb[20].mxu0 %v780_v60  ;;  %1091 = vmatmul.mubr.bf16.gmra.mrb[12].mxu1 %v780_v60 }
 0x395   :  { %1334 = vmatpush1.bf16.msra.mxu0 %v2560_v61  ;;  %2364 = vmatpush3.bf16.msra.mxu1 %v2607_v30 }
 0x396   :  { %1335 = vmatprep.subr.bf16.mxu0 %v2565_v62  ;;  %2365 = vmatprep.subr.bf16.mxu1 %v2608_v31 }
 0x399   :  { %1336 = vmatpush1.bf16.msra.mxu0 %v2563_v63  ;;  %2366 = vmatpush3.bf16.msra.mxu1 %v2609_v34  ;;  %v2630_v34 = vld [vmem:[#allocation16 + $0x40] ss:$8 sps:$4 sm:$0xff]  }
 0x39a   :  { %1337 = vmatprep.subr.bf16.mxu0 %v2568_v1 }
 0x39d   :  { %1338 = vmatpush1.bf16.msra.mxu0 %v2566_v2 }
 0x39e   :  { %1339 = vmatprep.subr.bf16.mxu0 %v2571_v3 }
 0x3a1   :  { %1340 = vmatpush1.bf16.msra.mxu0 %v2569_v4 }
 0x3a2   :  { %1341 = vmatprep.subr.bf16.mxu0 %v2574_v5 }
 0x3a5   :  { %1342 = vmatpush1.bf16.msra.mxu0 %v2572_v6 }
 0x3a6   :  { %1343 = vmatprep.subr.bf16.mxu0 %v2577_v7 }
 0x3a9   :  { %1344 = vmatpush1.bf16.msra.mxu0 %v2575_v8 }
 0x3aa   :  { %1345 = vmatprep.subr.bf16.mxu0 %v2580_v9 }
 0x3ad   :  { %1346 = vmatpush1.bf16.msra.mxu0 %v2578_v10 }
 0x3ae   :  { %1347 = vmatprep.subr.bf16.mxu0 %v2583_v11 }
 0x3b1   :  { %1348 = vmatpush1.bf16.msra.mxu0 %v2581_v12 }
 0x3b2   :  { %1349 = vmatprep.subr.bf16.mxu0 %v2586_v13 }
 0x3b5   :  { %1350 = vmatpush1.bf16.msra.mxu0 %v2584_v14 }
 0x3b6   :  { %1351 = vmatprep.subr.bf16.mxu0 %v2589_v15 }
 0x3b9   :  { %1352 = vmatpush1.bf16.msra.mxu0 %v2587_v16 }
 0x3ba   :  { %1353 = vmatprep.subr.bf16.mxu0 %v2592_v17 }
 0x3bd   :  { %1354 = vmatpush1.bf16.msra.mxu0 %v2590_v18 }
 0x3be   :  { %1355 = vmatprep.subr.bf16.mxu0 %v2595_v19 }
 0x3c1   :  { %1356 = vmatpush1.bf16.msra.mxu0 %v2593_v20 }
 0x3c2   :  { %1357 = vmatprep.subr.bf16.mxu0 %v2598_v22 }
 0x3c5   :  { %1358 = vmatpush1.bf16.msra.mxu0 %v2596_v21 }
 0x3c6   :  { %1359 = vmatprep.subr.bf16.mxu0 %v2601_v23 }
 0x3c9   :  { %1360 = vmatpush1.bf16.msra.mxu0 %v2599_v24 }
 0x45e   :  { %v1029_v39 = vpop.f32.mrb[16].mxu0  ;;  %v1082_v40 = vpop.f32.mrb[8].mxu1 }
 0x45f   :  { %v1030_v41 = vadd.f32 %v1029_v39, %v818_v35  ;;  %v1083_v42 = vadd.f32 %v1082_v40, %v826_v36  ;;  %v1031_v43 = vpop.f32.mrb[17].mxu0  ;;  %v1084_v44 = vpop.f32.mrb[9].mxu1  ;;  %v2614_v39 = vld [vmem:[#allocation14 + $0x70] sm:$0xff]  }
 0x460   :  { %v1032_v45 = vadd.f32 %v1031_v43, %v822_v37  ;;  %v1085_v48 = vadd.f32 %v1084_v44, %v830_v38  ;;  %v1033_v50 = vpop.f32.mrb[18].mxu0  ;;  %v1086_v51 = vpop.f32.mrb[10].mxu1  ;;  %v2615_v40 = vld [vmem:[#allocation14 + $0x30] sm:$0xff]   ;;  %v2620_v43 = vld [vmem:[#allocation16 + $0x4] ss:$8 sps:$4 sm:$0xff]  }
 0x461   :  { %2722 = vtanh.f32 %v1030_v41  ;;  %v1034_v52 = vadd.f32 %v1033_v50, %v818_v35  ;;  %v1035_v53 = vpop.f32.mrb[19].mxu0  ;;  %v1088_v46 = vpop.f32.mrb[11].mxu1  ;;  %v1087_v54 = vadd.f32 %v1086_v51, %v826_v36  ;;  %v2616_v41 = vld [vmem:[#allocation14 + $0x78] sm:$0xff]   ;;  %v1157_v44 = vld [vmem:[%s3487_s11] sm:$0x3] }
 0x462   :  { %2724 = vtanh.f32 %v1083_v42  ;;  %v1036_v55 = vadd.f32 %v1035_v53, %v822_v37  ;;  %v1089_v56 = vadd.f32 %v1088_v46, %v830_v38  ;;  %v2617_v42 = vld [vmem:[#allocation14 + $0x38] sm:$0xff]  }
 0x463   :  { %2726 = vtanh.f32 %v1032_v45  ;;  %v1162_v45 = vrot.slane %v1157_v44, %v3360_v47 }
 0x464   :  { %2728 = vtanh.f32 %v1085_v48  ;;  %v1166_v48 = vrot.slane %v1157_v44, %v3366_v49  ;;  %v2653_v44 = vld [vmem:[#allocation16 + $0xb4] ss:$8 sps:$4 sm:$0xff]  }
 0x465   :  { %2730 = vtanh.f32 %v1034_v52 }
 0x466   :  { %2732 = vtanh.f32 %v1087_v54  ;;  %v1039_v57 = vpop.f32.mrb[20].mxu0  ;;  %v1092_v58 = vpop.f32.mrb[12].mxu1 }
 0x467   :  { %2734 = vtanh.f32 %v1036_v55  ;;  %v1040_v59 = vadd.f32 %v1039_v57, %v818_v35  ;;  %v1041_v60 = vpop.f32.mrb[21].mxu0  ;;  %v1094_v61 = vpop.f32.mrb[13].mxu1  ;;  %v1093_v4 = vadd.f32 %v1092_v58, %v826_v36 }
 0x468   :  { %2736 = vtanh.f32 %v1089_v56  ;;  %v1042_v62 = vadd.f32 %v1041_v60, %v822_v37  ;;  %v1043_v63 = vpop.f32.mrb[22].mxu0  ;;  %v1096_v1 = vpop.f32.mrb[14].mxu1  ;;  %v1095_v7 = vadd.f32 %v1094_v61, %v830_v38 }
 0x469   :  { %2738 = vtanh.f32 %v1040_v59  ;;  %v1044_v2 = vadd.f32 %v1043_v63, %v818_v35  ;;  %v1045_v3 = vpop.f32.mrb[23].mxu0  ;;  %v1098_v5 = vpop.f32.mrb[15].mxu1  ;;  %v1097_v9 = vadd.f32 %v1096_v1, %v826_v36  ;;  %v2610_v35 = vld [vmem:[#allocation14 + $0x60] sm:$0xff]  }
 0x46a   :  { %2740 = vtanh.f32 %v1042_v62  ;;  %v1046_v6 = vadd.f32 %v1045_v3, %v822_v37  ;;  %v1099_v11 = vadd.f32 %v1098_v5, %v830_v38  ;;  %v2611_v36 = vld [vmem:[#allocation14 + $0x20] sm:$0xff]   ;;  %2367 = vmatprep.subr.bf16.mxu1 %v2610_v35  ;;  %v2612_v37 = vld [vmem:[#allocation14 + $0x68] sm:$0xff]   ;;  %v2635_v35 = vld [vmem:[#allocation16 + $0x54] ss:$8 sps:$4 sm:$0xff]  }
 0x46b   :  { %v2723_v8 = vpop.eup %2722  ;;  %2742 = vtanh.f32 %v1044_v2  ;;  %2368 = vmatpush3.bf16.msra.mxu1 %v2611_v36  ;;  %v2613_v38 = vld [vmem:[#allocation14 + $0x28] sm:$0xff]   ;;  %v2633_v36 = vld [vmem:[#allocation16 + $0x50] ss:$8 sps:$4 sm:$0xff]  }
 0x46c   :  { %v3389_v10 = vpop.eup %2724  ;;  %2744 = vtanh.f32 %v1046_v6  ;;  %2369 = vmatprep.subr.bf16.mxu1 %v2612_v37  ;;  %v2638_v37 = vld [vmem:[#allocation16 + $0x64] ss:$8 sps:$4 sm:$0xff]  }
 0x46d   :  { %v2727_v12 = vpop.eup %2726  ;;  %2746 = vtanh.f32 %v1093_v4 }
 0x46e   :  { %v3391_v13 = vpop.eup %2728  ;;  %2748 = vtanh.f32 %v1095_v7 }
 0x46f   :  { %v2731_v14 = vpop.eup %2730  ;;  %2750 = vtanh.f32 %v1097_v9  ;;  %2370 = vmatpush3.bf16.msra.mxu1 %v2613_v38  ;;  %v2623_v9 = vld [vmem:[#allocation16 + $0x14] ss:$8 sps:$4 sm:$0xff]   ;;  %v2636_v38 = vld [vmem:[#allocation16 + $0x60] ss:$8 sps:$4 sm:$0xff]  }
 0x470   :  { %v3393_v15 = vpop.eup %2732  ;;  %v1117_v16 = vpack.c.bf16 %v2731_v14, %v2723_v8  ;;  %2752 = vtanh.f32 %v1099_v11  ;;  %2371 = vmatprep.subr.bf16.mxu1 %v2614_v39  ;;  %v2618_v8 = vld [vmem:[#allocation16] ss:$8 sps:$4 sm:$0xff]   ;;  %v2641_v39 = vld [vmem:[#allocation16 + $0x74] ss:$8 sps:$4 sm:$0xff]  }
 0x471   :  { %v2735_v17 = vpop.eup %2734  ;;  %v1119_v18 = vpack.c.bf16 %v3393_v15, %v3389_v10  ;;  %v2672_v10 = vld [vmem:[#allocation17 + $0x58] sm:$0xff]  }
 0x472   :  { %v3397_v19 = vpop.eup %2736  ;;  %v1118_v20 = vpack.c.bf16 %v2735_v17, %v2727_v12  ;;  %v2621_v12 = vld [vmem:[#allocation16 + $0x10] ss:$8 sps:$4 sm:$0xff]  }
 0x473   :  { %v2739_v21 = vpop.eup %2738  ;;  %v1120_v22 = vpack.c.bf16 %v3397_v19, %v3391_v13  ;;  %2372 = vmatpush3.bf16.msra.mxu1 %v2615_v40  ;;  %v2639_v40 = vld [vmem:[#allocation16 + $0x70] ss:$8 sps:$4 sm:$0xff]   ;;  %v2644_v13 = vld [vmem:[#allocation16 + $0x84] ss:$8 sps:$4 sm:$0xff]   ;;  %v2642_v19 = vld [vmem:[#allocation16 + $0x80] ss:$8 sps:$4 sm:$0xff]  }
 0x474   :  { %v2741_v23 = vpop.eup %2740  ;;  %1361 = vmatprep.mubr.bf16.mxu0 %v1118_v20  ;;  %2373 = vmatprep.subr.bf16.mxu1 %v2616_v41  ;;  %v2645_v41 = vld [vmem:[#allocation16 + $0x90] ss:$8 sps:$4 sm:$0xff]  }
 0x475   :  { %v2743_v24 = vpop.eup %2742  ;;  %1362 = vmatmul.mubr.bf16.vlgmr.msra.gmra.mrb[24].mxu0 %v1117_v16  ;;  %v2626_v16 = vld [vmem:[#allocation16 + $0x24] ss:$8 sps:$4 sm:$0xff]   ;;  %v2673_v15 = vld [vmem:[#allocation17 + $0x18] sm:$0xff]  }
 0x476   :  { %v2745_v25 = vpop.eup %2744  ;;  %v1121_v26 = vpack.c.bf16 %v2743_v24, %v2739_v21  ;;  %v2624_v24 = vld [vmem:[#allocation16 + $0x20] ss:$8 sps:$4 sm:$0xff]  }
 0x477   :  { %v3401_v27 = vpop.eup %2746  ;;  %v1122_v28 = vpack.c.bf16 %v2745_v25, %v2741_v23  ;;  %2374 = vmatpush3.bf16.msra.mxu1 %v2617_v42  ;;  %v2629_v25 = vld [vmem:[#allocation16 + $0x34] ss:$8 sps:$4 sm:$0xff]   ;;  %v2650_v42 = vld [vmem:[#allocation16 + $0xa4] ss:$8 sps:$4 sm:$0xff]  }
 0x478   :  { %v3403_v29 = vpop.eup %2748  ;;  %1825 = vmatprep.subr.bf16.mxu1 %v2620_v43  ;;  %v2648_v43 = vld [vmem:[#allocation16 + $0xa0] ss:$8 sps:$4 sm:$0xff]  }
 0x479   :  { %v3405_v30 = vpop.eup %2750  ;;  %1371 = vmatprep.mubr.bf16.mxu0 %v1122_v28  ;;  %v2632_v28 = vld [vmem:[#allocation16 + $0x44] ss:$8 sps:$4 sm:$0xff]  }
 0x47a   :  { %v3407_v31 = vpop.eup %2752  ;;  %v1123_v32 = vpack.c.bf16 %v3405_v30, %v3401_v27  ;;  %v2676_v27 = vld [vmem:[#allocation17 + $0x68] sm:$0xff]  }
 0x47b   :  { %v1124_v33 = vpack.c.bf16 %v3407_v31, %v3403_v29  ;;  %v2675_v29 = vld [vmem:[#allocation17 + $0x20] sm:$0xff]   ;;  %v2677_v30 = vld [vmem:[#allocation17 + $0x28] sm:$0xff]   ;;  %v2678_v31 = vld [vmem:[#allocation17 + $0x70] sm:$0xff]  }
 0x47d   :  { %1372 = vmatmul.mubr.bf16.gmra.mrb[28].mxu0 %v1121_v26  ;;  %v2627_v26 = vld [vmem:[#allocation16 + $0x30] ss:$8 sps:$4 sm:$0xff]  }
 0x548   :  { %v1363_v50 = vpop.f32.mrb[24].mxu0 }
 0x549   :  { %v1364_v51 = vadd.f32 %v1363_v50, %v1162_v45  ;;  %v1365_v52 = vpop.f32.mrb[25].mxu0  ;;  %v2654_v50 = vld [vmem:[#allocation16 + $0xc0] ss:$8 sps:$4 sm:$0xff]  }
 0x54a   :  { %v1366_v53 = vadd.f32 %v1365_v52, %v1166_v48  ;;  %v1367_v46 = vpop.f32.mrb[26].mxu0  ;;  %v2657_v52 = vld [vmem:[#allocation16 + $0xd0] ss:$8 sps:$4 sm:$0xff]  }
 0x54b   :  { %2754 = vtanh.f32 %v1364_v51  ;;  %v1368_v54 = vadd.f32 %v1367_v46, %v1162_v45  ;;  %v1369_v55 = vpop.f32.mrb[27].mxu0  ;;  %v2659_v51 = vld [vmem:[#allocation16 + $0xd4] ss:$8 sps:$4 sm:$0xff]   ;;  %v2660_v46 = vld [vmem:[#allocation16 + $0xe0] ss:$8 sps:$4 sm:$0xff]  }
 0x54c   :  { %2756 = vtanh.f32 %v1366_v53  ;;  %v1370_v56 = vadd.f32 %v1369_v55, %v1166_v48  ;;  %v2662_v53 = vld [vmem:[#allocation16 + $0xe4] ss:$8 sps:$4 sm:$0xff]   ;;  %v2663_v55 = vld [vmem:[#allocation16 + $0xf0] ss:$8 sps:$4 sm:$0xff]  }
 0x54d   :  { %2758 = vtanh.f32 %v1368_v54  ;;  %v2665_v54 = vld [vmem:[#allocation16 + $0xf4] ss:$8 sps:$4 sm:$0xff]  }
 0x54e   :  { %2760 = vtanh.f32 %v1370_v56  ;;  %v2666_v56 = vld [vmem:[#allocation17 + $0x40] sm:$0xff]  }
 0x54f   :  { %2387 = vmatprep.subr.bf16.mxu0 %v2666_v56 }
 0x550   :  { %v1373_v57 = vpop.f32.mrb[28].mxu0 }
 0x551   :  { %v1374_v58 = vadd.f32 %v1373_v57, %v1162_v45  ;;  %v1375_v59 = vpop.f32.mrb[29].mxu0  ;;  %v2667_v57 = vld [vmem:[#allocation17] sm:$0xff]  }
 0x552   :  { %v1376_v60 = vadd.f32 %v1375_v59, %v1166_v48  ;;  %v1377_v61 = vpop.f32.mrb[30].mxu0  ;;  %2388 = vmatpush3.bf16.msra.mxu0 %v2667_v57  ;;  %v2669_v59 = vld [vmem:[#allocation17 + $0x8] sm:$0xff]  }
 0x553   :  { %2762 = vtanh.f32 %v1374_v58  ;;  %v1378_v62 = vadd.f32 %v1377_v61, %v1162_v45  ;;  %v1379_v63 = vpop.f32.mrb[31].mxu0  ;;  %v2651_v45 = vld [vmem:[#allocation16 + $0xb0] ss:$8 sps:$4 sm:$0xff]   ;;  %v2668_v58 = vld [vmem:[#allocation17 + $0x48] sm:$0xff]  }
 0x554   :  { %2764 = vtanh.f32 %v1376_v60  ;;  %v1380_v1 = vadd.f32 %v1379_v63, %v1166_v48  ;;  %v2656_v48 = vld [vmem:[#allocation16 + $0xc4] ss:$8 sps:$4 sm:$0xff]   ;;  %2389 = vmatprep.subr.bf16.mxu0 %v2668_v58  ;;  %v2670_v60 = vld [vmem:[#allocation17 + $0x50] sm:$0xff]   ;;  %v1578_v63 = vld [vmem:[#allocation5] sm:$0xff] }
 0x555   :  { %v2755_v2 = vpop.eup %2754  ;;  %2766 = vtanh.f32 %v1378_v62  ;;  %v2671_v61 = vld [vmem:[#allocation17 + $0x10] sm:$0xff]   ;;  %v2681_v62 = vld [vmem:[#allocation17 + $0x38] sm:$0xff]   ;;  %vm1579_vm1 = vnez %v1578_v63  ;;  %v1653_v58 = vld [vmem:[%s3491_s15] sm:$0x3]  ;;  %s3107_s15 = smov [#allocation19]  }
 0x556   :  { %v2757_v3 = vpop.eup %2756  ;;  %2768 = vtanh.f32 %v1380_v1  ;;  %2390 = vmatpush3.bf16.msra.mxu0 %v2669_v59  ;;  %v1584_v1 = vsel %vm1579_vm1, 16843009, %v3106_v0  ;;  %v1662_v59 = vrot.slane %v1653_v58, %v3366_v49  ;;  %s2107_s6 = sshll.u32 %s3107_s15, 4  ;;  %s2108_s6 = int_to_ptr.vmem [resolvable:$true] %s2107_s6 }
 0x557   :  { %v2759_v4 = vpop.eup %2758  ;;  %2391 = vmatprep.subr.bf16.mxu0 %v2670_v60  ;;  %s3030_s30 = scalar_lea.vmem %s2108_s6, 512  ;;  %p3035_p11 = scmp.lt.s32.totalorder %s2108_s6, %s2108_s6 }
 0x558   :  { %v2761_v5 = vpop.eup %2760  ;;  %v1390_v6 = vpack.c.bf16 %v2759_v4, %v2755_v2  ;;  %v1585_v2 = vunpack.c.0.s8 %v1584_v1  ;;  %p3031_p10 = scmp.ne.s32.totalorder %s2108_s6, %s3030_s30  ;;  %p3036_p12 = scmp.lt.s32.totalorder %s3030_s30, %s3030_s30 }
 0x559   :  { %v1391_v7 = vpack.c.bf16 %v2761_v5, %v2757_v3  ;;  %v1586_v3 = vunpack.c.1.s8 %v1584_v1 }
 0x55a   :  { %2392 = vmatpush3.bf16.msra.mxu0 %v2671_v61  ;;  %v1589_v4 = vpack.c.b16 %v1585_v2, %v1585_v2  ;;  %p3037_p13 = por %p3036_p12, %p3035_p11 }
 0x55b   :  { %1561 = vmatprep.mubr.bf16.mxu1 %v1391_v7  ;;  %2393 = vmatprep.subr.bf16.mxu0 %v2672_v10  ;;  %v1591_v5 = vpack.c.b16 %v1586_v3, %v1586_v3  ;;  %v1587_v7 = vunpack.c.2.s8 %v1584_v1 }
 0x55c   :  { %1562 = vmatmul.mubr.bf16.vlgmr.msra.gmra.mrb[16].mxu1 %v1390_v6  ;;  %p3038_p0 = pnand %p3037_p13, %p3031_p10 }
 0x55d   :  { %v2763_v11 = vpop.eup %2762  ;;  %1826 = vmatpush1.bf16.msra.mxu1 %v2618_v8  ;;  %v1590_v8 = vpack.c.b8 %v1589_v4, %v1589_v4 }
 0x55e   :  { %v2765_v14 = vpop.eup %2764  ;;  %1827 = vmatprep.subr.bf16.mxu1 %v2623_v9  ;;  %2394 = vmatpush3.bf16.msra.mxu0 %v2673_v15  ;;  %v2261_v9 = vld [vmem:[%s3489_s13] ss:$0 sm:$0xff] }
 0x55f   :  { %v2767_v17 = vpop.eup %2766  ;;  %vm1597_vm2 = vnez %v1590_v8 }
 0x560   :  { %v2769_v20 = vpop.eup %2768  ;;  %v1392_v21 = vpack.c.bf16 %v2767_v17, %v2763_v11  ;;  %v1592_v17 = vpack.c.b8 %v1591_v5, %v1591_v5 }
 0x561   :  { %1828 = vmatpush1.bf16.msra.mxu1 %v2621_v12  ;;  %v1393_v23 = vpack.c.bf16 %v2769_v20, %v2765_v14 }
 0x562   :  { %1829 = vmatprep.subr.bf16.mxu1 %v2626_v16  ;;  %v1588_v16 = vunpack.c.3.s8 %v1584_v1  ;;  %vm1598_vm3 = vnez %v1592_v17 }
 0x563   :  { %1569 = vmatprep.mubr.bf16.mxu1 %v1393_v23 }
 0x564   :  { %1570 = vmatmul.mubr.bf16.gmra.mrb[20].mxu1 %v1392_v21 }
 0x565   :  { %1830 = vmatpush1.bf16.msra.mxu1 %v2624_v24  ;;  %1857 = vmatprep.mubr.bf16.mxu1 %v1120_v22  ;;  %v2647_v22 = vld [vmem:[#allocation16 + $0x94] ss:$8 sps:$4 sm:$0xff]   ;;  %v1593_v24 = vpack.c.b16 %v1587_v7, %v1587_v7 }
 0x566   :  { %1831 = vmatprep.subr.bf16.mxu1 %v2629_v25 }
 0x569   :  { %1832 = vmatpush1.bf16.msra.mxu1 %v2627_v26  ;;  %v1595_v26 = vpack.c.b16 %v1588_v16, %v1588_v16 }
 0x56a   :  { %1833 = vmatprep.subr.bf16.mxu1 %v2632_v28  ;;  %v1601_v28 = vsel %vm1597_vm2, 16843009, %v3106_v0 }
 0x56d   :  { %1834 = vmatpush1.bf16.msra.mxu1 %v2630_v34 }
 0x56e   :  { %1835 = vmatprep.subr.bf16.mxu1 %v2635_v35  ;;  %v1594_v35 = vpack.c.b8 %v1593_v24, %v1593_v24 }
 0x570   :  { %vm1599_vm4 = vnez %v1594_v35 }
 0x571   :  { %1836 = vmatpush1.bf16.msra.mxu1 %v2633_v36 }
 0x572   :  { %1837 = vmatprep.subr.bf16.mxu1 %v2638_v37  ;;  %v1602_v37 = vsel %vm1598_vm3, 16843009, %v3106_v0 }
 0x575   :  { %1838 = vmatpush1.bf16.msra.mxu1 %v2636_v38 }
 0x576   :  { %1839 = vmatprep.subr.bf16.mxu1 %v2641_v39 }
 0x579   :  { %1840 = vmatpush1.bf16.msra.mxu1 %v2639_v40  ;;  %v1596_v40 = vpack.c.b8 %v1595_v26, %v1595_v26 }
 0x57a   :  { %1841 = vmatprep.subr.bf16.mxu1 %v2644_v13  ;;  %v1605_v13 = vunpack.c.0.s8 %v1601_v28 }
 0x57b   :  { %vm1600_vm5 = vnez %v1596_v40 }
 0x57c   :  { %vm1609_vm6 = vcmp.ne.s32.totalorder %v1605_v13, 0 }
 0x57d   :  { %1842 = vmatpush1.bf16.msra.mxu1 %v2642_v19 }
 0x57e   :  { %1843 = vmatprep.subr.bf16.mxu1 %v2647_v22 }
 0x581   :  { %1844 = vmatpush1.bf16.msra.mxu1 %v2645_v41 }
 0x582   :  { %1845 = vmatprep.subr.bf16.mxu1 %v2650_v42  ;;  %v1606_v42 = vunpack.c.0.s8 %v1602_v37 }
 0x584   :  { %vm1610_vm7 = vcmp.ne.s32.totalorder %v1606_v42, 0 }
 0x585   :  { %1846 = vmatpush1.bf16.msra.mxu1 %v2648_v43 }
 0x586   :  { %1847 = vmatprep.subr.bf16.mxu1 %v2653_v44  ;;  %v1603_v44 = vsel %vm1599_vm4, 16843009, %v3106_v0 }
 0x589   :  { %1848 = vmatpush1.bf16.msra.mxu1 %v2651_v45 }
 0x58a   :  { %1849 = vmatprep.subr.bf16.mxu1 %v2656_v48  ;;  %v1604_v48 = vsel %vm1600_vm5, 16843009, %v3106_v0  ;;  %v1658_v0 = vrot.slane %v1653_v58, %v3360_v47 }
 0x58d   :  { %1850 = vmatpush1.bf16.msra.mxu1 %v2654_v50 }
 0x58e   :  { %1851 = vmatprep.subr.bf16.mxu1 %v2659_v51 }
 0x591   :  { %1852 = vmatpush1.bf16.msra.mxu1 %v2657_v52  ;;  %v1607_v52 = vunpack.c.0.s8 %v1603_v44 }
 0x592   :  { %1853 = vmatprep.subr.bf16.mxu1 %v2662_v53 }
 0x593   :  { %vm1611_vm8 = vcmp.ne.s32.totalorder %v1607_v52, 0 }
 0x595   :  { %1854 = vmatpush1.bf16.msra.mxu1 %v2660_v46  ;;  %v1608_v46 = vunpack.c.0.s8 %v1604_v48 }
 0x596   :  { %1855 = vmatprep.subr.bf16.mxu1 %v2665_v54 }
 0x597   :  { %vm1612_vm9 = vcmp.ne.s32.totalorder %v1608_v46, 0 }
 0x599   :  { %1856 = vmatpush1.bf16.msra.mxu1 %v2663_v55 }
 0x59c   :  { %1858 = vmatmul.mubr.bf16.vlgmr.msra.gmra.mrb[24].mxu1 %v1119_v18  ;;  %v2674_v18 = vld [vmem:[#allocation17 + $0x60] sm:$0xff]  }
 0x59d   :  { %1867 = vmatprep.mubr.bf16.mxu1 %v1124_v33  ;;  %2395 = vmatprep.subr.bf16.mxu0 %v2674_v18  ;;  %v2680_v33 = vld [vmem:[#allocation17 + $0x78] sm:$0xff]  }
 0x59e   :  { %2396 = vmatpush3.bf16.msra.mxu0 %v2675_v29 }
 0x59f   :  { %2397 = vmatprep.subr.bf16.mxu0 %v2676_v27 }
 0x5a2   :  { %2398 = vmatpush3.bf16.msra.mxu0 %v2677_v30 }
 0x5a3   :  { %2399 = vmatprep.subr.bf16.mxu0 %v2678_v31 }
 0x5a4   :  { %1868 = vmatmul.mubr.bf16.gmra.mrb[28].mxu1 %v1123_v32  ;;  %v2679_v32 = vld [vmem:[#allocation17 + $0x30] sm:$0xff]  }
 0x5a6   :  { %2400 = vmatpush3.bf16.msra.mxu0 %v2679_v32 }
 0x5a7   :  { %2401 = vmatprep.subr.bf16.mxu0 %v2680_v33 }
 0x5aa   :  { %2402 = vmatpush3.bf16.msra.mxu0 %v2681_v62 }
 0x62f   :  { %v2375_v6 = vpop.f32.mrb[16].mxu1 }
 0x630   :  { %v2376_v11 = vpop.f32.mrb[17].mxu1 }
 0x631   :  { %v2377_v12 = vadd.f32 %v2376_v11, %v2375_v6  ;;  %v2378_v14 = vpop.f32.mrb[18].mxu1 }
 0x632   :  { %v2379_v20 = vpop.f32.mrb[19].mxu1 }
 0x633   :  { %v1564_v21 = vadd.f32 %v2377_v12, %v2261_v9  ;;  %v2380_v23 = vadd.f32 %v2379_v20, %v2378_v14 }
 0x635   :  { %2770 = vtanh.f32 %v1564_v21  ;;  %v1567_v25 = vadd.f32 %v2380_v23, %v2261_v9 }
 0x637   :  { %2772 = vtanh.f32 %v1567_v25  ;;  %v2381_v34 = vpop.f32.mrb[20].mxu1 }
 0x638   :  { %v2382_v36 = vpop.f32.mrb[21].mxu1 }
 0x639   :  { %v2383_v38 = vadd.f32 %v2382_v36, %v2381_v34  ;;  %v2384_v39 = vpop.f32.mrb[22].mxu1 }
 0x63a   :  { %v2385_v19 = vpop.f32.mrb[23].mxu1 }
 0x63b   :  { %v1572_v22 = vadd.f32 %v2383_v38, %v2261_v9  ;;  %v2386_v41 = vadd.f32 %v2385_v19, %v2384_v39 }
 0x63d   :  { %2774 = vtanh.f32 %v1572_v22  ;;  %v1575_v43 = vadd.f32 %v2386_v41, %v2261_v9 }
 0x63f   :  { %v2771_v45 = vpop.eup %2770  ;;  %2776 = vtanh.f32 %v1575_v43 }
 0x640   :  { %v1613_v50 = vsel %vm1609_vm6, %v2771_v45, -1e+08 }
 0x641   :  { %v2773_v51 = vpop.eup %2772  ;;  %1617 = vst [vmem:[#allocation19] sm:$0xff] %v1613_v50 }
 0x642   :  { %v1614_v53 = vsel %vm1610_vm7, %v2773_v51, -1e+08 }
 0x643   :  { %1618 = vst [vmem:[#allocation19 + $0x8] sm:$0xff] %v1614_v53 }
 0x647   :  { %v2775_v54 = vpop.eup %2774 }
 0x648   :  { %v1615_v55 = vsel %vm1611_vm8, %v2775_v54, -1e+08 }
 0x649   :  { %v2777_v56 = vpop.eup %2776  ;;  %1619 = vst [vmem:[#allocation19 + $0x10] sm:$0xff] %v1615_v55 }
 0x64a   :  { %v1616_v57 = vsel %vm1612_vm9, %v2777_v56, -1e+08 }
 0x64b   :  { %1620 = vst [vmem:[#allocation19 + $0x18] sm:$0xff] %v1616_v57 }
 0x66f   :  { %v1859_v60 = vpop.f32.mrb[24].mxu1 }
 0x670   :  { %v1860_v61 = vadd.f32 %v1859_v60, %v1658_v0  ;;  %v1861_v10 = vpop.f32.mrb[25].mxu1 }
 0x671   :  { %v1862_v15 = vadd.f32 %v1861_v10, %v1662_v59  ;;  %v1863_v18 = vpop.f32.mrb[26].mxu1 }
 0x672   :  { %2778 = vtanh.f32 %v1860_v61  ;;  %v1864_v29 = vadd.f32 %v1863_v18, %v1658_v0  ;;  %v1865_v27 = vpop.f32.mrb[27].mxu1 }
 0x673   :  { %2780 = vtanh.f32 %v1862_v15  ;;  %v1866_v30 = vadd.f32 %v1865_v27, %v1662_v59 }
 0x674   :  { %2782 = vtanh.f32 %v1864_v29 }
 0x675   :  { %2784 = vtanh.f32 %v1866_v30 }
 0x677   :  { %v1869_v31 = vpop.f32.mrb[28].mxu1 }
 0x678   :  { %v1870_v32 = vadd.f32 %v1869_v31, %v1658_v0  ;;  %v1871_v33 = vpop.f32.mrb[29].mxu1 }
 0x679   :  { %v1872_v62 = vadd.f32 %v1871_v33, %v1662_v59  ;;  %v1873_v63 = vpop.f32.mrb[30].mxu1 }
 0x67a   :  { %2786 = vtanh.f32 %v1870_v32  ;;  %v1874_v47 = vadd.f32 %v1873_v63, %v1658_v0  ;;  %v1875_v49 = vpop.f32.mrb[31].mxu1 }
 0x67b   :  { %2788 = vtanh.f32 %v1872_v62  ;;  %v1876_v1 = vadd.f32 %v1875_v49, %v1662_v59 }
 0x67c   :  { %v2779_v2 = vpop.eup %2778  ;;  %2790 = vtanh.f32 %v1874_v47 }
 0x67d   :  { %v2781_v3 = vpop.eup %2780  ;;  %2792 = vtanh.f32 %v1876_v1 }
 0x67e   :  { %v2783_v4 = vpop.eup %2782 }
 0x67f   :  { %v2785_v5 = vpop.eup %2784  ;;  %v1886_v6 = vpack.c.bf16 %v2783_v4, %v2779_v2 }
 0x680   :  { %v1887_v7 = vpack.c.bf16 %v2785_v5, %v2781_v3 }
 0x682   :  { %2057 = vmatprep.mubr.bf16.mxu0 %v1887_v7 }
 0x683   :  { %2058 = vmatmul.mubr.bf16.vlgmr.msra.gmra.mrb[32].mxu0 %v1886_v6 }
 0x684   :  { %v2787_v8 = vpop.eup %2786 }
 0x685   :  { %v2789_v9 = vpop.eup %2788 }
 0x686   :  { %v2791_v11 = vpop.eup %2790 }
 0x687   :  { %v2793_v12 = vpop.eup %2792  ;;  %v1888_v14 = vpack.c.bf16 %v2791_v11, %v2787_v8 }
 0x688   :  { %v1889_v16 = vpack.c.bf16 %v2793_v12, %v2789_v9 }
 0x68a   :  { %2065 = vmatprep.mubr.bf16.mxu0 %v1889_v16 }
 0x68b   :  { %2066 = vmatmul.mubr.bf16.gmra.mrb[36].mxu0 %v1888_v14 }
 0x68c   :  { %3041 = shalt.err (!%p3038_p0)
}
 0x68d   :  { %s3042_s22 = scalar_lea.hbm %s3494_s18, 512 }
 0x68e   :  { %p3043_p1 = scmp.ne.s32.totalorder %s3494_s18, %s3042_s22  ;;  %p3046_p2 = scmp.lt.u32.totalorder %s3042_s22, %s3494_s18 }
 0x690   :  { %p3048_p3 = pnand %p3046_p2, %p3043_p1 }
 0x692   :  { %3051 = shalt.err (!%p3048_p3)
}
 0x693   :  { %2113 = dma.vmem_to_hbm [thread:$0]  %s2108_s6, 512, %s3494_s18, [#allocation4], %s3511_s12, %s3511_s12, %s3510_s27  }
 0x694   :  { %v2310_v20 = vld [vmem:[%s3493_s17] ss:$0 sm:$0xff]  ;;  %s3108_s17 = smov [#allocation20]  }
 0x695   :  { %s2119_s18 = sshll.u32 %s3108_s17, 4  ;;  %s2120_s18 = int_to_ptr.vmem [resolvable:$true] %s2119_s18 }
 0x696   :  { %s3052_s21 = scalar_lea.vmem %s2120_s18, 512  ;;  %p3057_p5 = scmp.lt.s32.totalorder %s2120_s18, %s2120_s18 }
 0x697   :  { %p3053_p4 = scmp.ne.s32.totalorder %s2120_s18, %s3052_s21  ;;  %p3058_p6 = scmp.lt.s32.totalorder %s3052_s21, %s3052_s21 }
 0x699   :  { %p3059_p7 = por %p3058_p6, %p3057_p5 }
 0x69b   :  { %p3060_p8 = pnand %p3059_p7, %p3053_p4 }
 0x756   :  { %v2403_v17 = vpop.f32.mrb[32].mxu0 }
 0x757   :  { %v2404_v21 = vpop.f32.mrb[33].mxu0 }
 0x758   :  { %v2405_v23 = vadd.f32 %v2404_v21, %v2403_v17  ;;  %v2406_v24 = vpop.f32.mrb[34].mxu0 }
 0x759   :  { %v2407_v25 = vpop.f32.mrb[35].mxu0 }
 0x75a   :  { %v2060_v26 = vadd.f32 %v2405_v23, %v2310_v20  ;;  %v2408_v28 = vadd.f32 %v2407_v25, %v2406_v24 }
 0x75c   :  { %v2327_v34 = vmul.f32 -1.442695, %v2060_v26  ;;  %v2063_v35 = vadd.f32 %v2408_v28, %v2310_v20 }
 0x75e   :  { %2794 = vpow2.f32 %v2327_v34  ;;  %v2328_v36 = vmul.f32 -1.442695, %v2063_v35  ;;  %v2409_v37 = vpop.f32.mrb[36].mxu0 }
 0x75f   :  { %v2410_v38 = vpop.f32.mrb[37].mxu0 }
 0x760   :  { %2796 = vpow2.f32 %v2328_v36  ;;  %v2411_v39 = vadd.f32 %v2410_v38, %v2409_v37  ;;  %v2412_v40 = vpop.f32.mrb[38].mxu0 }
 0x761   :  { %v2413_v13 = vpop.f32.mrb[39].mxu0 }
 0x762   :  { %v2068_v19 = vadd.f32 %v2411_v39, %v2310_v20  ;;  %v2414_v22 = vadd.f32 %v2413_v13, %v2412_v40 }
 0x764   :  { %v2329_v41 = vmul.f32 -1.442695, %v2068_v19  ;;  %v2071_v42 = vadd.f32 %v2414_v22, %v2310_v20 }
 0x766   :  { %2798 = vpow2.f32 %v2329_v41  ;;  %v2330_v43 = vmul.f32 -1.442695, %v2071_v42 }
 0x768   :  { %v2795_v44 = vpop.eup %2794  ;;  %2800 = vpow2.f32 %v2330_v43 }
 0x769   :  { %v2086_v45 = vadd.f32 1.0, %v2795_v44 }
 0x76a   :  { %v2797_v48 = vpop.eup %2796 }
 0x76b   :  { %2802 = vrcp.f32 %v2086_v45  ;;  %v2087_v50 = vadd.f32 1.0, %v2797_v48 }
 0x76d   :  { %2804 = vrcp.f32 %v2087_v50 }
 0x770   :  { %v2799_v51 = vpop.eup %2798 }
 0x771   :  { %v2088_v52 = vadd.f32 1.0, %v2799_v51 }
 0x772   :  { %v2801_v53 = vpop.eup %2800 }
 0x773   :  { %2806 = vrcp.f32 %v2088_v52  ;;  %v2089_v46 = vadd.f32 1.0, %v2801_v53 }
 0x775   :  { %v2803_v54 = vpop.eup %2802  ;;  %2808 = vrcp.f32 %v2089_v46 }
 0x776   :  { %2098 = vst [vmem:[#allocation20] sm:$0xff] %v2803_v54 }
 0x777   :  { %v2805_v55 = vpop.eup %2804 }
 0x778   :  { %2099 = vst [vmem:[#allocation20 + $0x8] sm:$0xff] %v2805_v55 }
 0x77d   :  { %v2807_v56 = vpop.eup %2806 }
 0x77e   :  { %2100 = vst [vmem:[#allocation20 + $0x10] sm:$0xff] %v2807_v56 }
 0x77f   :  { %v2809_v57 = vpop.eup %2808 }
 0x780   :  { %2101 = vst [vmem:[#allocation20 + $0x18] sm:$0xff] %v2809_v57 }
 0x781   :  { %3063 = shalt.err (!%p3060_p8)
}
 0x782   :  { %s3064_s23 = scalar_lea.hbm %s3495_s19, 512 }
 0x783   :  { %p3065_p9 = scmp.ne.s32.totalorder %s3495_s19, %s3064_s23  ;;  %p3068_p10 = scmp.lt.u32.totalorder %s3064_s23, %s3495_s19 }
 0x785   :  { %p3070_p11 = pnand %p3068_p10, %p3065_p9 }
 0x787   :  { %3073 = shalt.err (!%p3070_p11)
}
 0x788   :  { %2125 = dma.vmem_to_hbm [thread:$0]  %s2120_s18, 512, %s3495_s19, [#allocation21], %s3511_s12, %s3511_s12, %s3510_s27  }
 0x789   :  { %3086 = dma.done.wait [#allocation4], 512  }
 0x78a   :  { %3087 = vsyncadd [#allocation4], 4294966784 }
 0x78b   :  { %3088 = dma.done.wait [#allocation21], 512  }
 0x78c   :  { %3089 = vsyncadd [#allocation21], 4294966784 }
 0x78d   :  { %2132 = vsyncpa [#allocation3], 1 }
 0x78e   :  { %2133 = vsyncpa [#allocation6], 1 }
 0x78f   :  { %2134 = vsyncpa [#allocation9], 1 }
 0x790   :  { %2135 = vsyncpa [#allocation12], 1 }
 0x791   :  { %2136 = vsyncpa [#allocation15], 1 }
 0x792   :  { %2137 = vsyncpa [#allocation18], 1 }
 0x793   :  { %2138 = vsyncpa [#allocation4], 1 }
 0x794   :  { %2139 = vsyncpa [#allocation21], 1 }

</bundles_post_ra>
